<compile_context>
chip_gen: v6e
topology: v6e:2x2x1
jax: 0.10.0
libtpu: 0.0.40
codegen_flags: <defaults>
</compile_context>

<pallas_src>
import math

import jax
import jax.numpy as jnp
from jax.experimental import pallas as pl
from jax.experimental.pallas import tpu as pltpu


def _gelu(x):
    # activate_func() is undefined in the reference module; tanh-approx GELU assumed.
    c = math.sqrt(2.0 / math.pi)
    return 0.5 * x * (1.0 + jnp.tanh(c * (x + 0.044715 * x * x * x)))


def _dense_to_sparse_kernel(sp_ref, x_ref, w_ref, b_ref, o_ref):
    """One grid step processes a block of batch elements.

    sp_ref : [B, emb, n_stk]        sparse_fea block (native layout)
    x_ref  : [B, Cin, n_stk*W]      dense_fea block (NATIVE layout — no wrapper transpose)
    w_ref  : [3, Cin, Cout]         Conv2d(1,3) weights, tap-major, eval-BN folded in
    b_ref  : [1, Cout]              folded bias (f32)
    o_ref  : [B, 2*emb, n_stk]      final module output (sparse passthrough + conv-max)
    """
    emb = sp_ref.shape[1]
    S = sp_ref.shape[2]                       # n_stk
    B, cin, L = x_ref.shape
    cout = w_ref.shape[2]
    W = L // S                                # n_stk_pnt
    Wo = W - 2                                # 'valid' conv outputs per stroke

    # --- channel concat fused into the kernel: copy sparse_fea straight through. ---
    o_ref[:, :emb, :] = sp_ref[...].astype(o_ref.dtype)

    # --- conv(1,3) + BN(folded) + act + max over points, from the native layout. ---
    x = x_ref[...]                            # keep input dtype (bf16 stays bf16 on MXU)
    xt = jnp.swapaxes(x, 1, 2)                # [B, L, Cin]  (VMEM relayout, not an HBM pass)
    xw = xt.reshape(B, S, W, cin)             # split the point axis per stroke

    # 3 accumulated matmuls (one per conv tap) instead of a 3x-sized im2col intermediate.
    acc = jnp.zeros((B * S * Wo, cout), jnp.float32)
    for k in range(3):
        xk = xw[:, :, k:k + Wo, :].reshape(B * S * Wo, cin)
        acc = acc + jnp.dot(xk, w_ref[k], preferred_element_type=jnp.float32)

    y = _gelu(acc + b_ref[...])               # folded BN bias; f32 elementwise chain
    # TODO(synk): if the true activate_func is monotone (e.g. ReLU), hoist the max above
    #             the activation to cut elementwise work by ~Wo; not valid for GELU.
    y = jnp.max(y.reshape(B * S, Wo, cout), axis=1)       # torch.max(..., dim=3)[0]
    y = jnp.swapaxes(y.reshape(B, S, cout), 1, 2)          # [B, Cout, S]
    o_ref[:, emb:, :] = y.astype(o_ref.dtype)


def _pick_block_bs(bs, bytes_per_batch_elem, *, target_block_bytes=1 << 20,
                   min_grid_steps=8):
    """Largest divisor of bs giving >=min_grid_steps steps (when possible) and ~1 MiB blocks."""
    cap_steps = max(1, bs // min(min_grid_steps, max(bs, 1)))
    cap_bytes = max(1, target_block_bytes // max(1, int(bytes_per_batch_elem)))
    cap = min(bs, max(1, min(cap_steps, cap_bytes)))
    for d in range(cap, 0, -1):
        if bs % d == 0:
            return d
    return 1


def dense_to_sparse(sparse_fea, dense_fea, w, b, gamma, beta, mean, var,
                    n_stk, n_stk_pnt, *, eps=1e-5, block_bs=None,
                    vmem_limit_bytes=32 * 1024 * 1024):
    """DenseToSparse.forward (eval mode).

    sparse_fea: [bs, emb, n_stk]
    dense_fea : [bs, emb, n_stk * n_stk_pnt]
    w         : [3, emb, emb]   tap-major Conv2d(1,3) weights (tap, cin, cout)
    b, gamma, beta, mean, var : [emb]
    returns   : [bs, 2*emb, n_stk]
    """
    bs, emb, L = dense_fea.shape
    assert L == n_stk * n_stk_pnt, (L, n_stk, n_stk_pnt)
    assert n_stk_pnt >= 3, "kernel (1,3) valid conv needs at least 3 points per stroke"
    assert sparse_fea.shape == (bs, emb, n_stk), sparse_fea.shape
    cin = cout = emb

    # Fold eval-mode BatchNorm2d into the conv weight / bias (wrapper-side, once).
    scale = gamma * jax.lax.rsqrt(var + eps)                        # [Cout]
    w_folded = (w * scale[None, None, :]).astype(dense_fea.dtype)   # [3, Cin, Cout]
    b_folded = ((b - mean) * scale + beta).reshape(1, cout).astype(jnp.float32)

    if block_bs is None:
        block_bs = _pick_block_bs(bs, cin * L * dense_fea.dtype.itemsize)
    assert bs % block_bs == 0, "block_bs must divide bs"
    grid = (bs // block_bs,)

    return pl.pallas_call(
        _dense_to_sparse_kernel,
        out_shape=jax.ShapeDtypeStruct((bs, 2 * emb, n_stk), sparse_fea.dtype),
        grid_spec=pltpu.PrefetchScalarGridSpec(
            num_scalar_prefetch=0,
            grid=grid,
            in_specs=[
                pl.BlockSpec((block_bs, emb, n_stk), lambda i: (i, 0, 0)),   # sparse_fea
                pl.BlockSpec((block_bs, cin, L), lambda i: (i, 0, 0)),       # dense_fea (native)
                pl.BlockSpec((3, cin, cout), lambda i: (0, 0, 0)),           # folded weights
                pl.BlockSpec((1, cout), lambda i: (0, 0)),                   # folded bias
            ],
            out_specs=pl.BlockSpec((block_bs, 2 * emb, n_stk), lambda i: (i, 0, 0)),
        ),
        compiler_params=pltpu.CompilerParams(
            dimension_semantics=("parallel",),            # independent batch blocks
            vmem_limit_bytes=vmem_limit_bytes,
        ),
    )(sparse_fea, dense_fea, w_folded, b_folded)


def reference(sparse_fea, dense_fea, w, b, gamma, beta, mean, var,
              n_stk, n_stk_pnt, eps=1e-5):
    """Pure-JAX reference of the PyTorch module (eval mode), same param layout."""
    bs, emb, _ = dense_fea.shape
    x = dense_fea.reshape(bs, emb, n_stk, n_stk_pnt)
    wo = n_stk_pnt - 2
    y = sum(jnp.einsum('bcsw,cd->bdsw', x[:, :, :, k:k + wo], w[k])
            for k in range(3)) + b[None, :, None, None]
    y = (y - mean[None, :, None, None]) * jax.lax.rsqrt(var[None, :, None, None] + eps) \
        * gamma[None, :, None, None] + beta[None, :, None, None]
    y = _gelu(y)
    y = jnp.max(y, axis=3)                                  # [bs, emb, n_stk]
    return jnp.concatenate([sparse_fea, y], axis=1)         # [bs, 2*emb, n_stk]


if __name__ == "__main__":
    # Small shapes consistent with the module.
    bs = 2
    dense_in = 32          # emb
    n_stk = 8
    n_stk_pnt = 16

    key = jax.random.PRNGKey(0)
    ks = jax.random.split(key, 8)

    sparse_fea = jax.random.normal(ks[0], (bs, dense_in, n_stk), jnp.float32)
    dense_fea = jax.random.normal(ks[1], (bs, dense_in, n_stk * n_stk_pnt), jnp.float32)

    # Conv weights stored tap-major [3, Cin, Cout]; BN params per output channel.
    w = 0.2 * jax.random.normal(ks[2], (3, dense_in, dense_in), jnp.float32)
    b = 0.1 * jax.random.normal(ks[3], (dense_in,), jnp.float32)
    gamma = 1.0 + 0.1 * jax.random.normal(ks[4], (dense_in,), jnp.float32)
    beta = 0.1 * jax.random.normal(ks[5], (dense_in,), jnp.float32)
    mean = 0.1 * jax.random.normal(ks[6], (dense_in,), jnp.float32)
    var = 0.5 + 0.5 * jnp.abs(jax.random.normal(ks[7], (dense_in,), jnp.float32))

    out = dense_to_sparse(sparse_fea, dense_fea, w, b, gamma, beta, mean, var,
                          n_stk, n_stk_pnt)
    out = jax.block_until_ready(out)

    ref = reference(sparse_fea, dense_fea, w, b, gamma, beta, mean, var,
                    n_stk, n_stk_pnt)
    assert out.shape == (bs, 2 * dense_in, n_stk), out.shape
    max_err = float(jnp.max(jnp.abs(out - ref)))
    assert jnp.allclose(out, ref, atol=2e-3, rtol=2e-3), max_err

    print("KERNEL_OK")
</pallas_src>

<mosaic_0001>
module attributes {stable_mosaic.version = 11 : i64} {
  func.func @_dense_to_sparse_kernel(%arg0: i32, %arg1: memref<1x32x8xf32, #tpu.memory_space<vmem>>, %arg2: memref<1x32x128xf32, #tpu.memory_space<vmem>>, %arg3: memref<3x32x32xf32, #tpu.memory_space<vmem>>, %arg4: memref<1x32xf32, #tpu.memory_space<vmem>>, %arg5: memref<1x64x8xf32, #tpu.memory_space<vmem>>) attributes {dimension_semantics = [#tpu.dimension_semantics<parallel>], iteration_bounds = array<i64: 2>, scalar_prefetch = 0 : i64, scratch_operands = 0 : i64, tpu.core_type = #tpu.core_type<tc>, window_params = [{transform_indices = @transform_0, window_bounds = array<i64: 1, 32, 8>}, {transform_indices = @transform_1, window_bounds = array<i64: 1, 32, 128>}, {pipeline_mode = #tpu.pipeline_mode<synchronous>, transform_indices = @transform_2, window_bounds = array<i64: 3, 32, 32>}, {pipeline_mode = #tpu.pipeline_mode<synchronous>, transform_indices = @transform_3, window_bounds = array<i64: 1, 32>}, {transform_indices = @transform_4, window_bounds = array<i64: 1, 64, 8>}]} {
    %c0 = arith.constant 0 : index
    %c0_0 = arith.constant 0 : index
    %c0_1 = arith.constant 0 : index
    %0 = vector.load %arg1[%c0, %c0_0, %c0_1] : memref<1x32x8xf32, #tpu.memory_space<vmem>>, vector<1x32x8xf32>
    %c0_2 = arith.constant 0 : index
    %c0_3 = arith.constant 0 : index
    %c0_4 = arith.constant 0 : index
    %1 = vector.load %arg5[%c0_2, %c0_3, %c0_4] : memref<1x64x8xf32, #tpu.memory_space<vmem>>, vector<1x32x8xf32>
    tpu.vector_store %arg5[%c0_2, %c0_3, %c0_4], %0 {strides = array<i32>} : memref<1x64x8xf32, #tpu.memory_space<vmem>>, vector<1x32x8xf32>,
    %c0_5 = arith.constant 0 : index
    %c0_6 = arith.constant 0 : index
    %c0_7 = arith.constant 0 : index
    %2 = vector.load %arg2[%c0_5, %c0_6, %c0_7] : memref<1x32x128xf32, #tpu.memory_space<vmem>>, vector<1x32x128xf32>
    %3 = tpu.transpose %2, [0, 2, 1] : vector<1x32x128xf32> -> vector<1x128x32xf32>
    %4 = vector.shape_cast %3 : vector<1x128x32xf32> to vector<1x8x16x32xf32>
    %cst = arith.constant 0.000000e+00 : f32
    %5 = vector.broadcast %cst : f32 to vector<112x32xf32>
    %6 = vector.extract_strided_slice %4 {offsets = [0, 0, 0, 0], sizes = [1, 8, 14, 32], strides = [1, 1, 1, 1]} : vector<1x8x16x32xf32> to vector<1x8x14x32xf32>
    %7 = vector.shape_cast %6 : vector<1x8x14x32xf32> to vector<112x32xf32>
    %c0_8 = arith.constant 0 : index
    %c0_9 = arith.constant 0 : index
    %c0_10 = arith.constant 0 : index
    %8 = vector.load %arg3[%c0_8, %c0_9, %c0_10] : memref<3x32x32xf32, #tpu.memory_space<vmem>>, vector<1x32x32xf32>
    %9 = vector.shape_cast %8 : vector<1x32x32xf32> to vector<32x32xf32>
    %cst_11 = arith.constant dense<0.000000e+00> : vector<112x32xf32>
    %10 = tpu.matmul %7, %9, %cst_11 {dimension_numbers = #tpu.dot_dimension_numbers<[1], [0], [0], [1], [0, 0, 1, 1], [], []>} : vector<112x32xf32>, vector<32x32xf32>, vector<112x32xf32> -> vector<112x32xf32>
    %11 = arith.addf %5, %10 : vector<112x32xf32>
    %12 = vector.extract_strided_slice %4 {offsets = [0, 0, 1, 0], sizes = [1, 8, 14, 32], strides = [1, 1, 1, 1]} : vector<1x8x16x32xf32> to vector<1x8x14x32xf32>
    %13 = vector.shape_cast %12 : vector<1x8x14x32xf32> to vector<112x32xf32>
    %c1 = arith.constant 1 : index
    %c0_12 = arith.constant 0 : index
    %c0_13 = arith.constant 0 : index
    %14 = vector.load %arg3[%c1, %c0_12, %c0_13] : memref<3x32x32xf32, #tpu.memory_space<vmem>>, vector<1x32x32xf32>
    %15 = vector.shape_cast %14 : vector<1x32x32xf32> to vector<32x32xf32>
    %cst_14 = arith.constant dense<0.000000e+00> : vector<112x32xf32>
    %16 = tpu.matmul %13, %15, %cst_14 {dimension_numbers = #tpu.dot_dimension_numbers<[1], [0], [0], [1], [0, 0, 1, 1], [], []>} : vector<112x32xf32>, vector<32x32xf32>, vector<112x32xf32> -> vector<112x32xf32>
    %17 = arith.addf %11, %16 : vector<112x32xf32>
    %18 = vector.extract_strided_slice %4 {offsets = [0, 0, 2, 0], sizes = [1, 8, 14, 32], strides = [1, 1, 1, 1]} : vector<1x8x16x32xf32> to vector<1x8x14x32xf32>
    %19 = vector.shape_cast %18 : vector<1x8x14x32xf32> to vector<112x32xf32>
    %c2 = arith.constant 2 : index
    %c0_15 = arith.constant 0 : index
    %c0_16 = arith.constant 0 : index
    %20 = vector.load %arg3[%c2, %c0_15, %c0_16] : memref<3x32x32xf32, #tpu.memory_space<vmem>>, vector<1x32x32xf32>
    %21 = vector.shape_cast %20 : vector<1x32x32xf32> to vector<32x32xf32>
    %cst_17 = arith.constant dense<0.000000e+00> : vector<112x32xf32>
    %22 = tpu.matmul %19, %21, %cst_17 {dimension_numbers = #tpu.dot_dimension_numbers<[1], [0], [0], [1], [0, 0, 1, 1], [], []>} : vector<112x32xf32>, vector<32x32xf32>, vector<112x32xf32> -> vector<112x32xf32>
    %23 = arith.addf %17, %22 : vector<112x32xf32>
    %c0_18 = arith.constant 0 : index
    %c0_19 = arith.constant 0 : index
    %24 = vector.load %arg4[%c0_18, %c0_19] : memref<1x32xf32, #tpu.memory_space<vmem>>, vector<1x32xf32>
    %25 = vector.broadcast %24 : vector<1x32xf32> to vector<112x32xf32>
    %26 = arith.addf %23, %25 : vector<112x32xf32>
    %cst_20 = arith.constant 5.000000e-01 : f32
    %27 = vector.broadcast %cst_20 : f32 to vector<112x32xf32>
    %28 = arith.mulf %27, %26 : vector<112x32xf32>
    %cst_21 = arith.constant 4.471500e-02 : f32
    %29 = vector.broadcast %cst_21 : f32 to vector<112x32xf32>
    %30 = arith.mulf %29, %26 : vector<112x32xf32>
    %31 = arith.mulf %30, %26 : vector<112x32xf32>
    %32 = arith.mulf %31, %26 : vector<112x32xf32>
    %33 = arith.addf %26, %32 : vector<112x32xf32>
    %cst_22 = arith.constant 0.797884583 : f32
    %34 = vector.broadcast %cst_22 : f32 to vector<112x32xf32>
    %35 = arith.mulf %34, %33 : vector<112x32xf32>
    %36 = math.tanh %35 : vector<112x32xf32>
    %cst_23 = arith.constant 1.000000e+00 : f32
    %37 = vector.broadcast %cst_23 : f32 to vector<112x32xf32>
    %38 = arith.addf %37, %36 : vector<112x32xf32>
    %39 = arith.mulf %28, %38 : vector<112x32xf32>
    %40 = vector.shape_cast %39 : vector<112x32xf32> to vector<8x14x32xf32>
    %cst_24 = arith.constant dense<0xFF800000> : vector<8x32xf32>
    %41 = vector.multi_reduction <maximumf>, %40, %cst_24 [1] : vector<8x14x32xf32> to vector<8x32xf32>
    %42 = vector.shape_cast %41 : vector<8x32xf32> to vector<1x8x32xf32>
    %43 = tpu.transpose %42, [0, 2, 1] : vector<1x8x32xf32> -> vector<1x32x8xf32>
    %c0_25 = arith.constant 0 : index
    %c32 = arith.constant 32 : index
    %c0_26 = arith.constant 0 : index
    %44 = vector.load %arg5[%c0_25, %c32, %c0_26] : memref<1x64x8xf32, #tpu.memory_space<vmem>>, vector<1x32x8xf32>
    tpu.vector_store %arg5[%c0_25, %c32, %c0_26], %43 {strides = array<i32>} : memref<1x64x8xf32, #tpu.memory_space<vmem>>, vector<1x32x8xf32>,
    return
  }
  func.func @transform_0(%arg0: i32) -> (i32, i32, i32) {
    %c0_i32 = arith.constant 0 : i32
    %c0_i32_0 = arith.constant 0 : i32
    %c0_i32_1 = arith.constant 0 : i32
    return %arg0, %c0_i32, %c0_i32_0 : i32, i32, i32
  }
  func.func @transform_1(%arg0: i32) -> (i32, i32, i32) {
    %c0_i32 = arith.constant 0 : i32
    %c0_i32_0 = arith.constant 0 : i32
    %c0_i32_1 = arith.constant 0 : i32
    return %arg0, %c0_i32, %c0_i32_0 : i32, i32, i32
  }
  func.func @transform_2(%arg0: i32) -> (i32, i32, i32) {
    %c0_i32 = arith.constant 0 : i32
    %c0_i32_0 = arith.constant 0 : i32
    %c0_i32_1 = arith.constant 0 : i32
    %c0_i32_2 = arith.constant 0 : i32
    return %c0_i32, %c0_i32_0, %c0_i32_1 : i32, i32, i32
  }
  func.func @transform_3(%arg0: i32) -> (i32, i32) {
    %c0_i32 = arith.constant 0 : i32
    %c0_i32_0 = arith.constant 0 : i32
    %c0_i32_1 = arith.constant 0 : i32
    return %c0_i32, %c0_i32_0 : i32, i32
  }
  func.func @transform_4(%arg0: i32) -> (i32, i32, i32) {
    %c0_i32 = arith.constant 0 : i32
    %c0_i32_0 = arith.constant 0 : i32
    %c0_i32_1 = arith.constant 0 : i32
    return %arg0, %c0_i32, %c0_i32_0 : i32, i32, i32
  }
}

</mosaic_0001>

<bundles_post_ra>
// kernel: tpu_custom_call.1
= control target key start
LH: loop header
LB: loop body
LE: loop exit
PB: predicated region body
PF: predicated region fallthrough
CT: control target
= control target key end

     0   :  { %9 = vsyncpa [#allocation3], 0  ;;  %s3208_s15 = smov 0   ;;  %s4412_s0 = inlined_call_operand.vmem [shape: f32[2,32,8], index: 0, kind: input, shape index: {}]   ;;  %s4413_s1 = inlined_call_operand.vmem [shape: f32[2,32,128], index: 1, kind: input, shape index: {}]   ;;  %s4414_s2 = inlined_call_operand.hbm [shape: f32[3,32,32], index: 2, kind: input, shape index: {}]   ;;  %s4415_s3 = inlined_call_operand.vmem [shape: f32[1,32], index: 3, kind: input, shape index: {}]   ;;  %s4416_s4 = inlined_call_operand.vmem [shape: f32[2,64,8], index: 4, kind: output, shape index: {}]  }
   0x1 LB: > { %s2868_s16 = sadd.s32 4294967295, %s3177_s15   ;;  %p2870_p0 = scmp.ge.s32.totalorder %s3177_s15, 1  ;;  %s3177_s15 = sphi %s3208_s15, %s15_s15  }
   0x2   : > { %p140_p1 = scmp.lt.s32.totalorder %s3177_s15, 3  ;;  %s3179_s17 = smov [#allocation2]  }
   0x3   : > { %s152_s18 = sshll.u32 %s3179_s17, 4  ;;  %p3098_p3 = scmp.eq.s32.totalorder %s2868_s16, 0  ;;  %s153_s18 = int_to_ptr.vmem [resolvable:$true] %s152_s18 }
   0x4   : > { %p3216_p2 = pnand %p2870_p0, %p140_p1  ;;  %s3152_s20 = scalar_lea.vmem %s153_s18, 1536 }
   0x5   : > { %p3153_p7 = scmp.ne.s32.totalorder %s153_s18, %s3152_s20  ;;  %p3160_p10 = scmp.lt.s32.totalorder %s153_s18, %s153_s18 }
   0x6   : > { %p3094_p4 = pneg %p3216_p2  ;;  %p3161_p11 = scmp.lt.s32.totalorder %s3152_s20, %s3152_s20 }
   0x8   : > { %p3095_p5 = pnand %p3098_p3, %p3094_p4  ;;  %p3162_p12 = por %p3161_p11, %p3160_p10 }
   0xa   : > { %p3143_p6 = pneg %p3095_p5 }
   0xc   : > { %p3155_p8 = pnand %p3153_p7, %p3143_p6 }
   0xe   : > { %p3156_p9 = pneg %p3155_p8 }
  0x10   : > { %p3163_p13 = pnand %p3162_p12, %p3156_p9 }
  0x12   : > { %3166 = shalt.err (!%p3163_p13)
}
  0x13   : > { %s3180_s21 = smov 128   ;;  %s3181_s22 = smov 8  }
  0x14   : > { %3097 = dma.hbm_to_vmem [thread:$0]  (!%p3095_p5), %s4414_s2, 1536, %s153_s18, [#allocation3], %s3180_s21, %s3180_s21, %s3181_s22  }
  0x15   : > { %187 = sbr.rel (%p3216_p2) target bundleno = 721 (0x2d1), region = 36 }
  0x1a   : > { %3172 = dma.done.wait (%p3098_p3), [#allocation3], 1536  }
  0x1b   : > { %3174 = vsyncadd (%p3098_p3), [#allocation3], 4294965760  ;;  %p218_p0 = scmp.lt.s32.totalorder %s2868_s16, 1  ;;  %vm237_vm0 = vcmask 64512   ;;  %v757_v8 = vld [vmem:[#allocation2 + $0x38] sm:$0xff]  ;;  %v756_v9 = vld [vmem:[#allocation2 + $0x30] sm:$0xff]  ;;  %v298_v16 = vlaneseq }
  0x1c   : > { %2995 = vmatprep.subr.mxu0 %v757_v8  ;;  %3082 = vmatprep.subr.mxu1 %v757_v8  ;;  %v755_v10 = vld [vmem:[#allocation2 + $0x28] sm:$0xff]  ;;  %v754_v11 = vld [vmem:[#allocation2 + $0x20] sm:$0xff]  ;;  %v3249_v12 = vld [vmem:[#allocation2 + $0x58] sm:$0xff]  ;;  %v3182_v14 = vmov 1983009808   ;;  %vm570_vm1 = vcmask 1040384  }
  0x1d   : > { %s4573_s16 = smov (!%p218_p0, %s2868_s16), 1  ;;  %2996 = vmatpush3.msra.mxu0 %v757_v8  ;;  %3086 = vmatpush3.msra.mxu1 %v757_v8  ;;  %v3252_v13 = vld [vmem:[#allocation2 + $0x18] sm:$0xff]  ;;  %v296_v15 = vunpack.c.l.s4 %v3182_v14  ;;  %v299_v18 = vshrl.u32 %v298_v16, 7  ;;  %vm571_vm2 = vcmask 1042434   ;;  %vm573_vm4 = vcmask 1044484  }
  0x1e   : > { %s2938_s25 = sshll.u32 %s4573_s16, 5  ;;  %s2940_s26 = sshll.u32 %s4573_s16, 6  ;;  %2997 = vmatprep.subr.mxu0 %v756_v9  ;;  %3083 = vmatprep.subr.mxu1 %v756_v9  ;;  %vm572_vm3 = vmor %vm570_vm1, %vm571_vm2  ;;  %vm575_vm6 = vcmask 1046534   ;;  %vm996_vm8 = vcmask 261120   ;;  %vm2661_vm9 = vcmask 259072   ;;  %vm2741_vm10 = vcmask 1041409  }
  0x1f   : > { %s222_s29 = scalar_lea.vmem %s4412_s0, %s2938_s25  ;;  %s227_s6 = scalar_lea.vmem %s4413_s1, %s2938_s25  ;;  %2998 = vmatpush3.msra.mxu0 %v756_v9  ;;  %3087 = vmatpush3.msra.mxu1 %v756_v9  ;;  %v297_v17 = vunpack.c.0.s8 %v296_v15  ;;  %vm574_vm5 = vmor %vm572_vm3, %vm573_vm4  ;;  %vm2744_vm11 = vcmask 1043459   ;;  %vm2747_vm12 = vcmask 1045509   ;;  %vm2750_vm13 = vcmask 1047559  }
  0x20   : > { %s3239_s9 = scalar_lea.vmem %s4416_s4, %s2940_s26  ;;  %v242_v0 = vld [vmem:[%s227_s6] sm:$0xff]  ;;  %v234_v2 = vld [vmem:[%s222_s29 + $0x8] sm:$0xff]  ;;  %v235_v3 = vld [vmem:[%s222_s29 + $0x10] sm:$0xff]  ;;  %2999 = vmatprep.subr.mxu0 %v755_v10  ;;  %3084 = vmatprep.subr.mxu1 %v755_v10 }
  0x21   : > { %v233_v1 = vld [vmem:[%s222_s29] sm:$0xff]  ;;  %246 = vxpose.xlu0.b32.start [1/4] (short) %v242_v0, 128  ;;  %v236_v4 = vld [vmem:[%s222_s29 + $0x18] sm:$0xff]  ;;  %239 = vst.msk [vmem:[%s3239_s9 + $0x8] sm:$0xff] %vm237_vm0, %v234_v2  ;;  %240 = vst.msk [vmem:[%s3239_s9 + $0x10] sm:$0xff] %vm237_vm0, %v235_v3  ;;  %3000 = vmatpush3.msra.mxu0 %v755_v10  ;;  %v3255_v19 = vsub.s32 %v297_v17, %v299_v18 }
  0x22   : > { %238 = vst.msk [vmem:[%s3239_s9] sm:$0xff] %vm237_vm0, %v233_v1  ;;  %241 = vst.msk [vmem:[%s3239_s9 + $0x18] sm:$0xff] %vm237_vm0, %v236_v4  ;;  %v243_v5 = vld [vmem:[%s227_s6 + $0x8] sm:$0xff]  ;;  %v244_v6 = vld [vmem:[%s227_s6 + $0x10] sm:$0xff]  ;;  %3088 = vmatpush3.msra.mxu1 %v755_v10  ;;  %3001 = vmatprep.subr.mxu0 %v754_v11 }
  0x23   : > { %v245_v7 = vld [vmem:[%s227_s6 + $0x18] sm:$0xff]  ;;  %3085 = vmatprep.subr.mxu1 %v754_v11  ;;  %3002 = vmatpush3.msra.mxu0 %v754_v11  ;;  %vm3290_vm7 = vmor %vm574_vm5, %vm575_vm6 }
  0x24   : > { %3089 = vmatpush3.msra.mxu1 %v754_v11  ;;  %3053 = vmatprep.subr.mxu0 %v3249_v12 }
  0x25   : > { %247 = vxpose.xlu0.b32.cont [2/4] (short) %v243_v5, 128  ;;  %3024 = vmatprep.subr.mxu1 %v3252_v13 }
  0x29   : > { %248 = vxpose.xlu0.b32.cont [3/4] (short) %v244_v6, 128 }
  0x2d   : > { %249 = vxpose.xlu0.b32.end [4/4] (short) %v245_v7, 128 }
  0x9d   : > { %v262_v20 = vpop.trf.xlu0 }
  0x9e   : > { %v294_v21 = vcombine.high %v262_v20, %v262_v20  ;;  %v3258_v22 = vrot.slane %v262_v20, %v3255_v19 }
  0xa0   : > { %4457 = vst [vmem:[#allocation5_spill] sm:$0xff] %v3258_v22  ;;  %v3262_v23 = vcombine.high %v3258_v22, %v3258_v22  ;;  %v3266_v24 = vrot.slane %v294_v21, %v3255_v19  ;;  %v2881_v37 = vrot.slane %v3258_v22, 9 }
  0xa1   : > { %v263_v25 = vpop.trf.xlu0 }
  0xa2   : > { %4458 = vst [vmem:[#allocation6_spill] sm:$0xff] %v3262_v23  ;;  %4459 = vst [vmem:[#allocation7_spill] sm:$0xff] %v3266_v24  ;;  %v311_v27 = vcombine.high %v263_v25, %v263_v25  ;;  %v3271_v28 = vrot.slane %v263_v25, %v3255_v19  ;;  %v579_v29 = vrot.slane %v3262_v23, 7  ;;  %v3277_v30 = vcombine.high %v3266_v24, %v3266_v24 }
  0xa3   : > { %v582_v42 = vrot.slane %v3266_v24, 7 }
  0xa4   : > { %4460 = vst [vmem:[#allocation8_spill] sm:$0xff] %v3277_v30  ;;  %v3281_v31 = vcombine.high %v3271_v28, %v3271_v28  ;;  %v3284_v33 = vrot.slane %v311_v27, %v3255_v19  ;;  %v581_v41 = vrot.slane %v579_v29, 2  ;;  %v588_v43 = vrot.slane %v3271_v28, 7 }
  0xa5   : > { %v264_v32 = vpop.trf.xlu0  ;;  %v580_v46 = vsel %vm3290_vm7, %v2881_v37, %v579_v29  ;;  %v585_v47 = vrot.slane %v3277_v30, 7  ;;  %v584_v59 = vrot.slane %v582_v42, 2 }
  0xa6   : > { %v327_v34 = vcombine.high %v264_v32, %v264_v32  ;;  %v3287_v35 = vrot.slane %v264_v32, %v3255_v19  ;;  %v1177_v39 = vcombine.low %v3271_v28, %v3281_v31  ;;  %v562_v48 = vcombine.high %v3284_v33, %v3284_v33 }
  0xa7   : > { %v591_v52 = vrot.slane %v3281_v31, 7  ;;  %v583_v58 = vsel %vm3290_vm7, %v581_v41, %v582_v42  ;;  %v590_v60 = vrot.slane %v588_v43, 2  ;;  %v1583_v61 = vcombine.low %v3281_v31, %v3284_v33 }
  0xa8   : > { %v3300_v40 = vrot.slane %v327_v34, %v3255_v19  ;;  %v1178_v44 = vcombine.low %v3284_v33, %v3287_v35  ;;  %v3315_v50 = vcombine.high %v3287_v35, %v3287_v35  ;;  %v3323_v53 = vrot.slane %v1177_v39, %v3255_v19 }
  0xa9   : > { %v265_v45 = vpop.trf.xlu0  ;;  %v2917_v56 = vcombine.high %v3284_v33, %v3287_v35  ;;  %v594_v1 = vrot.slane %v3284_v33, 7  ;;  %v593_v5 = vrot.slane %v591_v52, 2  ;;  %v597_v6 = vrot.slane %v562_v48, 7 }
  0xaa   : > { %4463 = vst [vmem:[#allocation9_spill] sm:$0xff] %v3315_v50  ;;  %v3319_v51 = vcombine.high %v3300_v40, %v3300_v40  ;;  %4464 = vst [vmem:[#allocation10_spill] sm:$0xff] %v3323_v53  ;;  %v3326_v54 = vrot.slane %v1178_v44, %v3255_v19  ;;  %v344_v55 = vcombine.high %v265_v45, %v265_v45  ;;  %v601_v2 = vrot.slane %v3315_v50, 7 }
  0xab   : > { %v3331_v57 = vrot.slane %v265_v45, %v3255_v19  ;;  %v604_v7 = vrot.slane %v3300_v40, 7  ;;  %v2882_v9 = vrot.slane %v3287_v35, 9  ;;  %v3352_v10 = vrot.slane %v2917_v56, %v3255_v19 }
  0xac   : > { %4465 = vst [vmem:[#allocation11_spill] sm:$0xff] %v3326_v54  ;;  %v3340_v63 = vrot.slane %v344_v55, %v3255_v19  ;;  %v3360_v15 = vrot.slane %v1583_v61, %v3255_v19  ;;  %v603_v21 = vrot.slane %v601_v2, 2  ;;  %v607_v25 = vrot.slane %v3319_v51, 7 }
  0xad   : > { %v266_v0 = vpop.trf.xlu0  ;;  %v3356_v11 = vcombine.high %v3331_v57, %v3331_v57  ;;  %v610_v14 = vrot.slane %v3331_v57, 7  ;;  %v587_v29 = vrot.slane %v585_v47, 2  ;;  %v606_v31 = vrot.slane %v604_v7, 2 }
  0xae   : > { %v360_v4 = vcombine.high %v266_v0, %v266_v0  ;;  %v3348_v8 = vrot.slane %v266_v0, %v3255_v19  ;;  %v3364_v16 = vcombine.high %v3340_v63, %v3340_v63  ;;  %v616_v17 = vrot.slane %v3340_v63, 7 }
  0xaf   : > { %4467 = vst [vmem:[#allocation13_spill] sm:$0xff] %v3356_v11  ;;  %v586_v33 = vsel %vm3290_vm7, %v584_v59, %v585_v47  ;;  %v758_v34 = vcombine.low %v580_v46, %v583_v58  ;;  %v612_v37 = vrot.slane %v610_v14, 2  ;;  %v613_v39 = vrot.slane %v3356_v11, 7 }
  0xb0   : > { %4466 = vst [vmem:[#allocation12_spill] sm:$0xff] %v3348_v8  ;;  %v3369_v18 = vcombine.high %v3348_v8, %v3348_v8  ;;  %v3373_v27 = vrot.slane %v360_v4, %v3255_v19  ;;  %v589_v41 = vsel %vm3290_vm7, %v587_v29, %v588_v43  ;;  %v3386_v42 = vrot.slane %v616_v17, 2 }
  0xb1   : > { %v267_v20 = vpop.trf.xlu0  ;;  %v619_v44 = vrot.slane %v3364_v16, 7  ;;  %v759_v47 = vcombine.low %v586_v33, %v589_v41  ;;  %v2883_v48 = vrot.slane %v3348_v8, 9  ;;  %v766_v43 = vrot.slane %v758_v34, %v3255_v19 }
  0xb2   : > { %v626_v55 = vrot.slane %v3373_v27, 7  ;;  %v377_v56 = vcombine.high %v267_v20, %v267_v20  ;;  %v3394_v58 = vrot.slane %v267_v20, %v3255_v19  ;;  %v595_v61 = vsel %vm3290_vm7, %v593_v5, %v594_v1 }
  0xb3   : > { %v773_v59 = vrot.slane %v759_v47, %v3255_v19  ;;  %v596_v0 = vrot.slane %v594_v1, 2  ;;  %v3402_v4 = vcombine.high %v3373_v27, %v3373_v27  ;;  %v592_v20 = vsel %vm3290_vm7, %v590_v60, %v591_v52 }
  0xb4   : > { %v3406_v29 = vcombine.high %v3394_v58, %v3394_v58  ;;  %v602_v33 = vsel %vm3290_vm7, %v2882_v9, %v601_v2  ;;  %v615_v34 = vrot.slane %v613_v39, 2  ;;  %v623_v41 = vrot.slane %v3369_v18, 7 }
  0xb5   : > { %v268_v46 = vpop.trf.xlu0  ;;  %v774_v47 = vcombine.low %v766_v43, %v773_v59  ;;  %v775_v5 = vcombine.low %v592_v20, %v595_v61  ;;  %v3413_v62 = vrot.slane %v626_v55, 2  ;;  %v598_v52 = vsel %vm3290_vm7, %v596_v0, %v597_v6 }
  0xb6   : > { %v3423_v60 = vrot.slane %v377_v56, %v3255_v19  ;;  %v776_v2 = vcombine.low %v598_v52, %v602_v33  ;;  %v393_v9 = vcombine.high %v268_v46, %v268_v46  ;;  %v3426_v43 = vrot.slane %v268_v46, %v3255_v19 }
  0xb7   : > { %3003 = vmatprep.mubr.msk.f32.mxu0 %vm996_vm8, %v774_v47  ;;  %v629_v59 = vrot.slane %v3402_v4, 7  ;;  %v632_v61 = vrot.slane %v3394_v58, 7  ;;  %v783_v20 = vrot.slane %v775_v5, %v3255_v19  ;;  %v609_v3 = vrot.slane %v607_v25, 2 }
  0xb8   : > { %4468 = vst [vmem:[#allocation14_spill] sm:$0xff] %v3423_v60  ;;  %4469 = vst [vmem:[#allocation15_spill] sm:$0xff] %v3426_v43  ;;  %v790_v26 = vrot.slane %v776_v2, %v3255_v19  ;;  %v3433_v6 = vrot.slane %v393_v9, %v3255_v19  ;;  %v605_v56 = vsel %vm3290_vm7, %v603_v21, %v604_v7  ;;  %v625_v2 = vrot.slane %v623_v41, 2 }
  0xb9   : > { %v269_v1 = vpop.trf.xlu0  ;;  %v608_v0 = vsel %vm3290_vm7, %v606_v31, %v607_v25  ;;  %v624_v33 = vsel %vm3290_vm7, %v2883_v48, %v623_v41  ;;  %v611_v5 = vsel %vm3290_vm7, %v609_v3, %v610_v14  ;;  %v614_v52 = vsel %vm3290_vm7, %v612_v37, %v613_v39  ;;  %v1564_v3 = vld [vmem:[#allocation2 + $0x50] sm:$0xff] }
  0xba   : > { %v564_v7 = vcombine.high %v3423_v60, %v3423_v60  ;;  %v791_v21 = vcombine.low %v783_v20, %v790_v26  ;;  %v3451_v25 = vcombine.high %v3433_v6, %v3433_v6  ;;  %v635_v31 = vrot.slane %v3406_v29, 7 }
  0xbb   : > { %v792_v48 = vcombine.low %v605_v56, %v608_v0  ;;  %v793_v9 = vcombine.low %v611_v5, %v614_v52  ;;  %v3455_v47 = vrot.slane %v269_v1, %v3255_v19  ;;  %v634_v14 = vrot.slane %v632_v61, 2  ;;  %v1563_v5 = vld [vmem:[#allocation2 + $0x48] sm:$0xff] }
  0xbc   : > { %4470 = vst [vmem:[#allocation16_spill] sm:$0xff] %v3451_v25  ;;  %v638_v37 = vrot.slane %v3423_v60, 7  ;;  %3004 = vmatmul.mubr.msk.f32.vlgmr.msra.gmra.mxu0 %vm996_vm8, %v791_v21  ;;  %v410_v39 = vcombine.high %v269_v1, %v269_v1  ;;  %v3465_v41 = vcombine.high %v3426_v43, %v3426_v43  ;;  %v617_v0 = vsel %vm3290_vm7, %v615_v34, %v616_v17  ;;  %v1562_v1 = vld [vmem:[#allocation2 + $0x40] sm:$0xff] }
  0xbd   : > { %v270_v46 = vpop.trf.xlu0  ;;  %4471 = vst [vmem:[#allocation17_spill] sm:$0xff] %v3455_v47  ;;  %v800_v20 = vrot.slane %v792_v48, %v3255_v19  ;;  %v807_v56 = vrot.slane %v793_v9, %v3255_v19  ;;  %3054 = vmatpush3.msra.mxu0 %v3249_v12  ;;  %v3476_v52 = vcombine.high %v3455_v47, %v3455_v47  ;;  %v637_v12 = vrot.slane %v635_v31, 2 }
  0xbe   : > { %4472 = vst [vmem:[#allocation18_spill] sm:$0xff] %v3465_v41  ;;  %v620_v21 = vsel %vm3290_vm7, %v3386_v42, %v619_v44  ;;  %v627_v48 = vsel %vm3290_vm7, %v625_v2, %v626_v55  ;;  %3055 = vmatprep.subr.mxu0 %v1564_v3  ;;  %v3489_v34 = vrot.slane %v564_v7, 7  ;;  %v2884_v9 = vrot.slane %v3426_v43, 9 }
  0xbf   : > { %4473 = vst [vmem:[#allocation19_spill] sm:$0xff] %v3476_v52  ;;  %v808_v26 = vcombine.low %v800_v20, %v807_v56  ;;  %3056 = vmatpush3.msra.mxu0 %v1564_v3  ;;  %v3495_v35 = vrot.slane %v410_v39, %v3255_v19  ;;  %v809_v42 = vcombine.low %v617_v0, %v620_v21  ;;  %v645_v55 = vrot.slane %v3465_v41, 7 }
  0xc0   : > { %v810_v44 = vcombine.low %v624_v33, %v627_v48  ;;  %3057 = vmatprep.subr.mxu0 %v1563_v5  ;;  %v648_v2 = vrot.slane %v3433_v6, 7  ;;  %v654_v7 = vrot.slane %v3455_v47, 7  ;;  %v426_v20 = vcombine.high %v270_v46, %v270_v46 }
  0xc1   : > { %v3487_v17 = vpop.trf.xlu0  ;;  %4474 = vst [vmem:[#allocation20_spill] sm:$0xff] %v3495_v35  ;;  %3006 = vmatprep.mubr.msk.f32.mxu0 %vm996_vm8, %v808_v26  ;;  %3058 = vmatpush3.msra.mxu0 %v1563_v5  ;;  %v657_v3 = vrot.slane %v3476_v52, 7  ;;  %v817_v56 = vrot.slane %v809_v42, %v3255_v19  ;;  %v3505_v0 = vrot.slane %v270_v46, %v3255_v19  ;;  %v631_v26 = vrot.slane %v629_v59, 2 }
  0xc2   : > { %v824_v39 = vrot.slane %v810_v44, %v3255_v19  ;;  %3059 = vmatprep.subr.mxu0 %v1562_v1  ;;  %v3508_v33 = vrot.slane %v426_v20, %v3255_v19  ;;  %v636_v21 = vsel %vm3290_vm7, %v634_v14, %v635_v31  ;;  %v639_v5 = vsel %vm3290_vm7, %v637_v12, %v638_v37 }
  0xc3   : > { %4475 = vst [vmem:[#allocation21_spill] sm:$0xff] %v3505_v0  ;;  %3060 = vmatpush3.msra.mxu0 %v1562_v1  ;;  %v3520_v46 = vcombine.high %v3495_v35, %v3495_v35  ;;  %v660_v48 = vrot.slane %v3495_v35, 7  ;;  %v827_v44 = vcombine.low %v636_v21, %v639_v5  ;;  %v647_v32 = vrot.slane %v645_v55, 2 }
  0xc4   : > { %4476 = vst [vmem:[#allocation22_spill] sm:$0xff] %v3508_v33  ;;  %v825_v42 = vcombine.low %v817_v56, %v824_v39  ;;  %v3525_v45 = vcombine.high %v3505_v0, %v3505_v0  ;;  %v630_v31 = vsel %vm3290_vm7, %v3413_v62, %v629_v59  ;;  %v633_v14 = vsel %vm3290_vm7, %v631_v26, %v632_v61 }
  0xc5   : > { %v272_v20 = vpop.trf.xlu0  ;;  %v650_v1 = vrot.slane %v648_v2, 2  ;;  %v651_v12 = vrot.slane %v3451_v25, 7  ;;  %v656_v56 = vrot.slane %v654_v7, 2  ;;  %v826_v39 = vcombine.low %v630_v31, %v633_v14 }
  0xc6   : > { %4477 = vst [vmem:[#allocation23_spill] sm:$0xff] %v3525_v45  ;;  %3007 = vmatmul.mubr.msk.f32.gmra.mxu0 %vm996_vm8, %v825_v42  ;;  %v659_v21 = vrot.slane %v657_v3, 2  ;;  %v841_v62 = vrot.slane %v827_v44, %v3255_v19  ;;  %v662_v59 = vrot.slane %v660_v48, 2  ;;  %v663_v49 = vrot.slane %v3520_v46, 7 }
  0xc7   : > { %v3545_v61 = vcombine.high %v3508_v33, %v3508_v33  ;;  %v834_v26 = vrot.slane %v826_v39, %v3255_v19  ;;  %v2885_v42 = vrot.slane %v3505_v0, 9  ;;  %v667_v31 = vrot.slane %v3525_v45, 7 }
  0xc8   : > { %v443_v5 = vcombine.high %v3487_v17, %v3487_v17  ;;  %v640_v38 = vrot.slane %v638_v37, 2  ;;  %v646_v54 = vsel %vm3290_vm7, %v2884_v9, %v645_v55  ;;  %v649_v39 = vsel %vm3290_vm7, %v647_v32, %v648_v2 }
  0xc9   : > { %v842_v44 = vcombine.low %v834_v26, %v841_v62  ;;  %v273_v53 = vpop.trf.xlu0  ;;  %v4478_v0 = vrot.slane %v3508_v33, 7  ;;  %v3566_v14 = vrot.slane %v3487_v17, %v3255_v19  ;;  %v652_v62 = vsel %vm3290_vm7, %v650_v1, %v651_v12 }
  0xca   : > { %v459_v26 = vcombine.high %v272_v20, %v272_v20  ;;  %v642_v32 = vsel %vm3290_vm7, %v640_v38, %v3489_v34  ;;  %v844_v9 = vcombine.low %v649_v39, %v652_v62  ;;  %v653_v55 = vrot.slane %v651_v12, 2 }
  0xcb   : > { %v3562_v41 = vrot.slane %v4478_v0, 2  ;;  %4479 = vst [vmem:[#allocation24_spill] sm:$0xff] %v3566_v14  ;;  %3009 = vmatprep.mubr.msk.f32.mxu0 %vm996_vm8, %v842_v44  ;;  %v3577_v2 = vsel %vm3290_vm7, %v2885_v42, %v667_v31  ;;  %v843_v17 = vcombine.low %v642_v32, %v646_v54  ;;  %v658_v1 = vsel %vm3290_vm7, %v656_v56, %v657_v3 }
  0xcc   : > { %v3580_v0 = vrot.slane %v459_v26, %v3255_v19  ;;  %v669_v37 = vrot.slane %v667_v31, 2  ;;  %v3585_v44 = vrot.slane %v443_v5, %v3255_v19  ;;  %v858_v8 = vrot.slane %v844_v9, %v3255_v19 }
  0xcd   : > { %v655_v38 = vsel %vm3290_vm7, %v653_v55, %v654_v7  ;;  %v3592_v34 = vcombine.high %v3566_v14, %v3566_v14  ;;  %v851_v54 = vrot.slane %v843_v17, %v3255_v19  ;;  %v3596_v12 = vrot.slane %v272_v20, %v3255_v19  ;;  %v274_v7 = vpop.trf.xlu0 }
  0xce   : > { %4480 = vst [vmem:[#allocation25_spill] sm:$0xff] %v3580_v0  ;;  %v661_v3 = vsel %vm3290_vm7, %v659_v21, %v660_v48  ;;  %v664_v56 = vsel %vm3290_vm7, %v662_v59, %v663_v49  ;;  %v860_v5 = vcombine.low %v655_v38, %v658_v1  ;;  %v476_v42 = vcombine.high %v273_v53, %v273_v53 }
  0xcf   : > { %4481 = vst [vmem:[#allocation26_spill] sm:$0xff] %v3592_v34  ;;  %4482 = vst [vmem:[#allocation27_spill] sm:$0xff] %v3596_v12  ;;  %v3603_v31 = vrot.slane %v273_v53, %v3255_v19  ;;  %v676_v39 = vrot.slane %v3566_v14, 7  ;;  %v859_v62 = vcombine.low %v851_v54, %v858_v8  ;;  %v3608_v26 = vcombine.high %v3580_v0, %v3580_v0 }
  0xd0   : > { %v861_v20 = vcombine.low %v661_v3, %v664_v56  ;;  %v4423_v32 = vrot.slane %v3580_v0, 7  ;;  %v868_v48 = vrot.slane %v860_v5, %v3255_v19  ;;  %v3613_v49 = vrot.slane %v476_v42, %v3255_v19 }
  0xd1   : > { %4483 = vst [vmem:[#allocation28_spill] sm:$0xff] %v3608_v26  ;;  %v3617_v53 = vcombine.high %v3603_v31, %v3603_v31  ;;  %3010 = vmatmul.mubr.msk.f32.gmra.mxu0 %vm996_vm8, %v859_v62  ;;  %v4422_v21 = vrot.slane %v3603_v31, 7  ;;  %v492_v59 = vcombine.high %v274_v7, %v274_v7  ;;  %v3623_v9 = vrot.slane %v274_v7, %v3255_v19  ;;  %v275_v50 = vpop.trf.xlu0 }
  0xd2   : > { %v875_v8 = vrot.slane %v861_v20, %v3255_v19  ;;  %v3629_v17 = vcombine.high %v3596_v12, %v3596_v12  ;;  %v4427_v38 = vrot.slane %v3613_v49, 7  ;;  %v3635_v3 = vcombine.high %v3613_v49, %v3613_v49 }
  0xd3   : > { %4484 = vst [vmem:[#allocation29_spill] sm:$0xff] %v3623_v9  ;;  %v4424_v1 = vrot.slane %v3617_v53, 7  ;;  %v3638_v56 = vrot.slane %v492_v59, %v3255_v19  ;;  %v3642_v5 = vcombine.high %v3623_v9, %v3623_v9  ;;  %v2886_v42 = vrot.slane %v3596_v12, 9 }
  0xd4   : > { %4485 = vst [vmem:[#allocation30_spill] sm:$0xff] %v3629_v17  ;;  %v876_v54 = vcombine.low %v868_v48, %v875_v8  ;;  %v3647_v7 = vrot.slane %v4423_v32, 2  ;;  %v3655_v48 = vrot.slane %v4422_v21, 2  ;;  %v3666_v62 = vrot.slane %v4427_v38, 2 }
  0xd5   : > { %4486 = vst [vmem:[#allocation31_spill] sm:$0xff] %v3642_v5  ;;  %v3659_v8 = vrot.slane %v4424_v1, 2  ;;  %v711_v55 = vrot.slane %v3642_v5, 7  ;;  %v2887_v20 = vrot.slane %v3623_v9, 9  ;;  %v4488_v32 = vrot.slane %v3545_v61, 7 }
  0xd6   : > { %3012 = vmatprep.mubr.msk.f32.mxu0 %vm996_vm8, %v876_v54  ;;  %v4487_v54 = vrot.slane %v3508_v33, 7  ;;  %v3678_v59 = vcombine.high %v3638_v56, %v3638_v56  ;;  %v4491_v9 = vcombine.low %v3277_v30, %v3271_v28  ;;  %v509_v5 = vcombine.high %v275_v50, %v275_v50  ;;  %v276_v30 = vpop.trf.xlu0 }
  0xd7   : > { %v675_v1 = vrot.slane %v4488_v32, 2  ;;  %v3685_v12 = vsel %vm3290_vm7, %v2887_v20, %v711_v55  ;;  %v3700_v20 = vrot.slane %v275_v50, %v3255_v19 }
  0xd8   : > { %v671_v21 = vsel %vm3290_vm7, %v669_v37, %v4487_v54  ;;  %4489 = vst [vmem:[#allocation32_spill] sm:$0xff] %v3685_v12  ;;  %v4490_v37 = vmov %v4488_v32  ;;  %v1581_v38 = vrot.slane %v4491_v9, %v3255_v19  ;;  %v4492_v12 = vcombine.low %v3262_v23, %v3266_v24 }
  0xd9   : > { %v674_v32 = vsel %vm3290_vm7, %v3562_v41, %v4490_v37  ;;  %v677_v54 = vsel %vm3290_vm7, %v675_v1, %v676_v39  ;;  %v877_v22 = vcombine.low %v3577_v2, %v671_v21  ;;  %v566_v1 = vcombine.high %v3585_v44, %v3585_v44 }
  0xda   : > { %v878_v14 = vcombine.low %v674_v32, %v677_v54  ;;  %v1574_v41 = vrot.slane %v4492_v12, %v3255_v19  ;;  %v678_v37 = vrot.slane %v676_v39, 2  ;;  %v679_v2 = vrot.slane %v3592_v34, 7 }
  0xdb   : > { %v885_v21 = vrot.slane %v877_v22, %v3255_v19  ;;  %v3712_v9 = vrot.slane %v509_v5, %v3255_v19  ;;  %v3716_v50 = vcombine.high %v3700_v20, %v3700_v20  ;;  %v3718_v32 = vrot.slane %v711_v55, 2 }
  0xdc   : > { %v892_v28 = vrot.slane %v878_v14, %v3255_v19  ;;  %v4493_v12 = vrot.slane %v3638_v56, 7  ;;  %v681_v23 = vrot.slane %v679_v2, 2  ;;  %v1582_v22 = vcombine.low %v1574_v41, %v1581_v38 }
  0xdd   : > { %v568_v34 = vcombine.high %v3712_v9, %v3712_v9  ;;  %v680_v55 = vsel %vm3290_vm7, %v678_v37, %v679_v2  ;;  %v689_v41 = vrot.slane %v3629_v17, 7  ;;  %v525_v2 = vcombine.high %v276_v30, %v276_v30 }
  0xde   : > { %v3722_v54 = vrot.slane %v4493_v12, 2  ;;  %v893_v24 = vcombine.low %v885_v21, %v892_v28  ;;  %v682_v12 = vrot.slane %v3585_v44, 7  ;;  %v1600_v28 = vcombine.low %v3300_v40, %v3319_v51 }
  0xdf   : > { %v690_v38 = vsel %vm3290_vm7, %v2886_v42, %v689_v41  ;;  %v691_v39 = vrot.slane %v689_v41, 2  ;;  %v4496_v17 = vrot.slane %v3700_v20, 7 }
  0xe0   : > { %4494 = vst [vmem:[#allocation33_spill] sm:$0xff] %v3722_v54  ;;  %v685_v54 = vrot.slane %v566_v1, 7  ;;  %3013 = vmatmul.mubr.msk.f32.gmra.mxu0 %vm996_vm8, %v893_v24  ;;  %v683_v5 = vsel %vm3290_vm7, %v681_v23, %v682_v12  ;;  %v684_v37 = vrot.slane %v682_v12, 2  ;;  %v4495_v1 = vcombine.low %v3331_v57, %v3356_v11 }
  0xe1   : > { %3061 = vmatprep.mubr.msk.f32.mxu0 %vm996_vm8, %v1582_v22  ;;  %v894_v21 = vcombine.low %v680_v55, %v683_v5  ;;  %v1608_v14 = vrot.slane %v1600_v28, %v3255_v19  ;;  %v3751_v22 = vrot.slane %v4496_v17, 2  ;;  %v3756_v12 = vrot.slane %v276_v30, %v3255_v19 }
  0xe2   : > { %v1615_v24 = vrot.slane %v4495_v1, %v3255_v19  ;;  %v686_v23 = vsel %vm3290_vm7, %v684_v37, %v685_v54  ;;  %v3759_v1 = vrot.slane %v525_v2, %v3255_v19  ;;  %v4497_v11 = vrot.slane %v3716_v50, 7 }
  0xe3   : > { %v3765_v5 = vrot.slane %v568_v34, 7  ;;  %v895_v55 = vcombine.low %v686_v23, %v690_v38  ;;  %v4498_v17 = vcombine.low %v3360_v15, %v3352_v10  ;;  %v3773_v30 = vcombine.high %v3756_v12, %v3756_v12 }
  0xe4   : > { %v3763_v42 = vrot.slane %v4497_v11, 2  ;;  %v1616_v41 = vcombine.low %v1608_v14, %v1615_v24  ;;  %v4442_v54 = vrot.slane %v3759_v1, 7  ;;  %v4499_v28 = vrot.slane %v3580_v0, 7 }
  0xe5   : > { %3062 = vmatmul.mubr.msk.f32.vlgmr.msra.gmra.mxu0 %vm996_vm8, %v4498_v17  ;;  %v4500_v34 = vrot.slane %v3608_v26, 7  ;;  %v902_v15 = vrot.slane %v894_v21, %v3255_v19  ;;  %v909_v14 = vrot.slane %v895_v55, %v3255_v19  ;;  %v3790_v38 = vcombine.high %v3759_v1, %v3759_v1  ;;  %v277_v55 = vpop.trf.xlu0 }
  0xe6   : > { %v693_v11 = vsel %vm3290_vm7, %v691_v39, %v4499_v28  ;;  %3064 = vmatprep.mubr.msk.f32.mxu0 %vm996_vm8, %v1616_v41  ;;  %v4502_v21 = vrot.slane %v3617_v53, 7  ;;  %v4503_v41 = vrot.slane %v3603_v31, 7 }
  0xe7   : > { %v696_v10 = vsel %vm3290_vm7, %v3647_v7, %v4500_v34  ;;  %v4501_v37 = vmov %v4500_v34  ;;  %v910_v17 = vcombine.low %v902_v15, %v909_v14  ;;  %v3811_v7 = vrot.slane %v4442_v54, 2 }
  0xe8   : > { %v697_v24 = vrot.slane %v4501_v37, 2  ;;  %v702_v23 = vsel %vm3290_vm7, %v3655_v48, %v4502_v21  ;;  %v911_v34 = vcombine.low %v693_v11, %v696_v10  ;;  %v1617_v37 = vcombine.low %v3340_v63, %v3364_v16 }
  0xe9   : > { %v4504_v48 = vcombine.low %v3369_v18, %v3373_v27  ;;  %v1635_v15 = vcombine.low %v3406_v29, %v3423_v60  ;;  %3015 = vmatprep.mubr.msk.f32.mxu1 %vm996_vm8, %v910_v17  ;;  %v4505_v16 = vcombine.low %v3402_v4, %v3394_v58  ;;  %v1652_v17 = vcombine.low %v3433_v6, %v3451_v25 }
  0xea   : > { %v699_v28 = vsel %vm3290_vm7, %v697_v24, %v4503_v41  ;;  %v919_v11 = vrot.slane %v911_v34, %v3255_v19  ;;  %v1625_v10 = vrot.slane %v1617_v37, %v3255_v19  ;;  %v542_v24 = vcombine.high %v277_v55, %v277_v55 }
  0xeb   : > { %v912_v39 = vcombine.low %v699_v28, %v702_v23  ;;  %v1632_v21 = vrot.slane %v4504_v48, %v3255_v19  ;;  %v1642_v14 = vrot.slane %v4505_v16, %v3255_v19  ;;  %v1649_v41 = vrot.slane %v1635_v15, %v3255_v19 }
  0xec   : > { %v3829_v28 = vrot.slane %v277_v55, %v3255_v19  ;;  %v3835_v37 = vrot.slane %v542_v24, %v3255_v19  ;;  %v1669_v16 = vcombine.low %v3495_v35, %v3520_v46  ;;  %v4506_v46 = vcombine.high %v3423_v60, %v3426_v43  ;;  %v4515_v60 = vld [vmem:[#allocation32_spill] sm:$0xff] }
  0xed   : > { %v926_v23 = vrot.slane %v912_v39, %v3255_v19  ;;  %v1633_v48 = vcombine.low %v1625_v10, %v1632_v21  ;;  %v1650_v2 = vcombine.low %v1642_v14, %v1649_v41  ;;  %v1666_v10 = vrot.slane %v1652_v17, %v3255_v19  ;;  %v560_v14 = vld [vmem:[#allocation2 + $0x10] sm:$0xff] }
  0xee   : > { %v3841_v39 = vcombine.high %v3829_v28, %v3829_v28  ;;  %v4443_v55 = vrot.slane %v3829_v28, 7  ;;  %v3847_v15 = vcombine.high %v3835_v37, %v3835_v37  ;;  %v4444_v21 = vrot.slane %v3835_v37, 7 }
  0xef   : > { %v927_v54 = vcombine.low %v919_v11, %v926_v23  ;;  %3065 = vmatmul.mubr.msk.f32.gmra.mxu0 %vm996_vm8, %v1633_v48  ;;  %v1659_v11 = vrot.slane %v4506_v46, %v3255_v19  ;;  %v4507_v24 = vrot.slane %v3773_v30, 7  ;;  %v4508_v46 = vcombine.low %v3455_v47, %v3476_v52 }
  0xf0   : > { %3067 = vmatprep.mubr.msk.f32.mxu0 %vm996_vm8, %v1650_v2  ;;  %v3863_v41 = vrot.slane %v4443_v55, 2  ;;  %v4446_v48 = vrot.slane %v3841_v39, 7  ;;  %v3870_v17 = vrot.slane %v4444_v21, 2  ;;  %v1683_v21 = vrot.slane %v1669_v16, %v3255_v19 }
  0xf1   : > { %v3857_v23 = vrot.slane %v4507_v24, 2  ;;  %3016 = vmatmul.mubr.msk.f32.vlgmr.msra.gmra.mxu1 %vm996_vm8, %v927_v54  ;;  %v1667_v34 = vcombine.low %v1659_v11, %v1666_v10  ;;  %v1676_v55 = vrot.slane %v4508_v46, %v3255_v19  ;;  %v4509_v25 = vrot.slane %v3613_v49, 7  ;;  %v559_v11 = vld [vmem:[#allocation2 + $0x8] sm:$0xff] }
  0xf2   : > { %3025 = vmatpush3.msra.mxu1 %v3252_v13  ;;  %v3878_v2 = vrot.slane %v4446_v48, 2  ;;  %v4510_v13 = vrot.slane %v3635_v3, 7  ;;  %v4511_v46 = vrot.slane %v3638_v56, 7  ;;  %v4543_v36 = vcombine.low %v3835_v37, %v3847_v15 }
  0xf3   : > { %v705_v54 = vsel %vm3290_vm7, %v3659_v8, %v4509_v25  ;;  %3026 = vmatprep.subr.mxu1 %v560_v14  ;;  %3068 = vmatmul.mubr.msk.f32.gmra.mxu0 %vm996_vm8, %v1667_v34  ;;  %v4512_v25 = vcombine.low %v3525_v45, %v3508_v33  ;;  %v4513_v34 = vld [vmem:[#allocation24_spill] sm:$0xff]  ;;  %v1684_v47 = vcombine.low %v1676_v55, %v1683_v21  ;;  %v4520_v33 = vld [vmem:[#allocation33_spill] sm:$0xff] }
  0xf4   : > { %v708_v10 = vsel %vm3290_vm7, %v3666_v62, %v4510_v13  ;;  %v715_v16 = vsel %vm3290_vm7, %v3718_v32, %v4511_v46  ;;  %v4514_v24 = vcombine.low %v3545_v61, %v4513_v34  ;;  %v4516_v13 = vld [vmem:[#allocation26_spill] sm:$0xff]  ;;  %3027 = vmatpush3.msra.mxu1 %v560_v14  ;;  %v4517_v32 = vld [vmem:[#allocation27_spill] sm:$0xff] }
  0xf5   : > { %v1693_v8 = vrot.slane %v4512_v25, %v3255_v19  ;;  %v928_v43 = vcombine.low %v705_v54, %v708_v10  ;;  %v929_v62 = vcombine.low %v4515_v60, %v715_v16  ;;  %v1702_v52 = vcombine.low %v4516_v13, %v3585_v44  ;;  %3028 = vmatprep.subr.mxu1 %v559_v11  ;;  %v558_v16 = vld [vmem:[#allocation2] sm:$0xff] }
  0xf6   : > { %v1700_v48 = vrot.slane %v4514_v24, %v3255_v19  ;;  %v4518_v46 = vcombine.high %v3585_v44, %v4517_v32  ;;  %v4519_v25 = vrot.slane %v3678_v59, 7  ;;  %3070 = vmatprep.mubr.msk.f32.mxu0 %vm996_vm8, %v1684_v47  ;;  %v4522_v54 = vrot.slane %v3716_v50, 7  ;;  %3029 = vmatpush3.msra.mxu1 %v559_v11 }
  0xf7   : > { %v936_v60 = vrot.slane %v928_v43, %v3255_v19  ;;  %v943_v14 = vrot.slane %v929_v62, %v3255_v19  ;;  %v4524_v43 = vrot.slane %v3712_v9, 7  ;;  %3030 = vmatprep.subr.mxu1 %v558_v16 }
  0xf8   : > { %v1701_v35 = vcombine.low %v1693_v8, %v1700_v48  ;;  %v1717_v45 = vrot.slane %v4518_v46, %v3255_v19  ;;  %v718_v24 = vsel %vm3290_vm7, %v4520_v33, %v4519_v25  ;;  %v4521_v55 = vmov %v4519_v25  ;;  %3031 = vmatpush3.msra.mxu1 %v558_v16 }
  0xf9   : > { %v719_v21 = vrot.slane %v4521_v55, 2  ;;  %v1710_v48 = vrot.slane %v1702_v52, %v3255_v19  ;;  %v724_v10 = vsel %vm3290_vm7, %v3751_v22, %v4522_v54  ;;  %v4523_v33 = vrot.slane %v3700_v20, 7 }
  0xfa   : > { %3071 = vmatmul.mubr.msk.f32.gmra.mxu0 %vm996_vm8, %v1701_v35  ;;  %v727_v52 = vsel %vm3290_vm7, %v3763_v42, %v4524_v43  ;;  %v1719_v8 = vcombine.low %v3580_v0, %v3608_v26  ;;  %v4525_v22 = vcombine.low %v3603_v31, %v3617_v53  ;;  %v944_v35 = vcombine.low %v936_v60, %v943_v14  ;;  %v4526_v42 = vld [vmem:[#allocation31_spill] sm:$0xff] }
  0xfb   : > { %v721_v47 = vsel %vm3290_vm7, %v719_v21, %v4523_v33  ;;  %v1718_v46 = vcombine.low %v1710_v48, %v1717_v45  ;;  %v946_v55 = vcombine.low %v724_v10, %v727_v52  ;;  %v1736_v54 = vcombine.low %v3613_v49, %v3635_v3 }
  0xfc   : > { %v1734_v62 = vrot.slane %v4525_v22, %v3255_v19  ;;  %v945_v25 = vcombine.low %v718_v24, %v721_v47  ;;  %v1727_v21 = vrot.slane %v1719_v8, %v3255_v19  ;;  %v4527_v33 = vcombine.low %v4526_v42, %v3638_v56  ;;  %3018 = vmatprep.mubr.msk.f32.mxu1 %vm996_vm8, %v944_v35 }
  0xfd   : > { %v4528_v0 = vrot.slane %v3712_v9, 7  ;;  %3073 = vmatprep.mubr.msk.f32.mxu0 %vm996_vm8, %v1718_v46  ;;  %v960_v11 = vrot.slane %v946_v55, %v3255_v19  ;;  %v4529_v24 = vrot.slane %v3773_v30, 7  ;;  %v4530_v3 = vrot.slane %v3756_v12, 9 }
  0xfe   : > { %v1751_v43 = vrot.slane %v4527_v33, %v3255_v19  ;;  %v953_v45 = vrot.slane %v945_v25, %v3255_v19  ;;  %v4531_v14 = vrot.slane %v3790_v38, 7  ;;  %v1744_v10 = vrot.slane %v1736_v54, %v3255_v19 }
  0xff   : > { %v728_v26 = vrot.slane %v4528_v0, 2  ;;  %v734_v60 = vsel %vm3290_vm7, %v4530_v3, %v4529_v24  ;;  %v1735_v0 = vcombine.low %v1727_v21, %v1734_v62  ;;  %v4532_v52 = vrot.slane %v3759_v1, 7 }
 0x100   : > { %v741_v48 = vrot.slane %v4531_v14, 2  ;;  %v961_v22 = vcombine.low %v953_v45, %v960_v11  ;;  %v4533_v35 = vmov %v4531_v14  ;;  %v1754_v25 = vcombine.low %v3716_v50, %v3712_v9 }
 0x101   : > { %v730_v47 = vsel %vm3290_vm7, %v728_v26, %v3765_v5  ;;  %v737_v8 = vsel %vm3290_vm7, %v3857_v23, %v4532_v52  ;;  %v740_v62 = vsel %vm3290_vm7, %v3811_v7, %v4533_v35  ;;  %3074 = vmatmul.mubr.msk.f32.gmra.mxu0 %vm996_vm8, %v1735_v0  ;;  %v1752_v26 = vcombine.low %v1744_v10, %v1751_v43 }
 0x102   : > { %v962_v46 = vcombine.low %v730_v47, %v734_v60  ;;  %v963_v5 = vcombine.low %v737_v8, %v740_v62  ;;  %v4534_v23 = vcombine.low %v3678_v59, %v3700_v20  ;;  %v1771_v55 = vcombine.low %v3759_v1, %v3790_v38  ;;  %3019 = vmatmul.mubr.msk.f32.gmra.mxu1 %vm996_vm8, %v961_v22  ;;  %v4540_v8 = vld [vmem:[#allocation8_spill] sm:$0xff]  ;;  %v4541_v22 = vld [vmem:[#allocation7_spill] sm:$0xff] }
 0x103   : > { %v1768_v21 = vrot.slane %v1754_v25, %v3255_v19  ;;  %v4535_v54 = vcombine.high %v3712_v9, %v3756_v12  ;;  %v4536_v43 = vrot.slane %v3829_v28, 7  ;;  %3076 = vmatprep.mubr.msk.f32.mxu0 %vm996_vm8, %v1752_v26  ;;  %v4537_v3 = vrot.slane %v3841_v39, 7 }
 0x104   : > { %v1761_v16 = vrot.slane %v4534_v23, %v3255_v19  ;;  %v970_v7 = vrot.slane %v962_v46, %v3255_v19  ;;  %v977_v11 = vrot.slane %v963_v5, %v3255_v19  ;;  %v1785_v24 = vrot.slane %v1771_v55, %v3255_v19  ;;  %v4545_v55 = vld [vmem:[#allocation6_spill] sm:$0xff] }
 0x105   : > { %v1778_v33 = vrot.slane %v4535_v54, %v3255_v19  ;;  %v743_v45 = vsel %vm3290_vm7, %v741_v48, %v4536_v43  ;;  %v746_v60 = vsel %vm3290_vm7, %v3863_v41, %v4537_v3  ;;  %v4538_v14 = vrot.slane %v3835_v37, 7  ;;  %v4549_v3 = vld [vmem:[#allocation13_spill] sm:$0xff] }
 0x106   : > { %v1769_v10 = vcombine.low %v1761_v16, %v1768_v21  ;;  %v4539_v48 = vrot.slane %v3847_v15, 7  ;;  %v979_v52 = vcombine.low %v743_v45, %v746_v60  ;;  %v1161_v35 = vcombine.low %v4541_v22, %v4540_v8  ;;  %v4544_v16 = vld [vmem:[#allocation5_spill] sm:$0xff]  ;;  %v4554_v8 = vld [vmem:[#allocation20_spill] sm:$0xff]  ;;  %v4555_v22 = vld [vmem:[#allocation19_spill] sm:$0xff] }
 0x107   : > { %v749_v0 = vsel %vm3290_vm7, %v3878_v2, %v4538_v14  ;;  %v978_v62 = vcombine.low %v970_v7, %v977_v11  ;;  %v1786_v46 = vcombine.low %v1778_v33, %v1785_v24  ;;  %v4542_v2 = vcombine.low %v3829_v28, %v3841_v39  ;;  %v4547_v33 = vld [vmem:[#allocation9_spill] sm:$0xff] }
 0x108   : > { %v752_v47 = vsel %vm3290_vm7, %v3870_v17, %v4539_v48  ;;  %3077 = vmatmul.mubr.msk.f32.gmra.mxu0 %vm996_vm8, %v1769_v10  ;;  %v1175_v25 = vrot.slane %v1161_v35, %v3255_v19  ;;  %v1802_v17 = vrot.slane %v4543_v36, %v3255_v19  ;;  %v987_v5 = vrot.slane %v979_v52, %v3255_v19  ;;  %v4560_v36 = vld [vmem:[#allocation23_spill] sm:$0xff] }
 0x109   : > { %v980_v41 = vcombine.low %v749_v0, %v752_v47  ;;  %v1795_v26 = vrot.slane %v4542_v2, %v3255_v19  ;;  %3021 = vmatprep.mubr.msk.f32.mxu1 %vm996_vm8, %v978_v62  ;;  %3079 = vmatprep.mubr.msk.f32.mxu0 %vm996_vm8, %v1786_v46  ;;  %v4546_v7 = vcombine.low %v4544_v16, %v4545_v55  ;;  %v4550_v0 = vld [vmem:[#allocation12_spill] sm:$0xff]  ;;  %v4556_v62 = vld [vmem:[#allocation10_spill] sm:$0xff]  ;;  %v4557_v46 = vld [vmem:[#allocation11_spill] sm:$0xff] }
 0x10a   : > { %v1194_v43 = vcombine.low %v4547_v33, %v3300_v40  ;;  %v4548_v11 = vcombine.low %v3319_v51, %v3331_v57  ;;  %v1211_v60 = vcombine.low %v4549_v3, %v3340_v63  ;;  %v1228_v40 = vcombine.low %v3373_v27, %v3402_v4  ;;  %v4552_v51 = vld [vmem:[#allocation18_spill] sm:$0xff]  ;;  %v4563_v16 = vld [vmem:[#allocation15_spill] sm:$0xff]  ;;  %v4568_v33 = vld [vmem:[#allocation28_spill] sm:$0xff] }
 0x10b   : > { %v994_v23 = vrot.slane %v980_v41, %v3255_v19  ;;  %v1168_v21 = vrot.slane %v4546_v7, %v3255_v19  ;;  %v1803_v54 = vcombine.low %v1795_v26, %v1802_v17  ;;  %v4551_v10 = vcombine.low %v4550_v0, %v3369_v18  ;;  %v4561_v17 = vld [vmem:[#allocation21_spill] sm:$0xff] }
 0x10c   : > { %v1209_v24 = vrot.slane %v4548_v11, %v3255_v19  ;;  %v1202_v14 = vrot.slane %v1194_v43, %v3255_v19  ;;  %v1246_v57 = vcombine.low %v4552_v51, %v3433_v6  ;;  %v4553_v63 = vcombine.low %v3394_v58, %v3406_v29  ;;  %v4559_v58 = vld [vmem:[#allocation22_spill] sm:$0xff]  ;;  %v4569_v11 = vld [vmem:[#allocation29_spill] sm:$0xff] }
 0x10d   : > { %v995_v45 = vcombine.low %v987_v5, %v994_v23  ;;  %v1176_v15 = vcombine.low %v1168_v21, %v1175_v25  ;;  %3080 = vmatmul.mubr.msk.f32.gmra.mxu0 %vm996_vm8, %v1803_v54  ;;  %v1226_v48 = vrot.slane %v4551_v10, %v3255_v19  ;;  %v1263_v35 = vcombine.low %v4555_v22, %v4554_v8  ;;  %v4562_v23 = vld [vmem:[#allocation14_spill] sm:$0xff] }
 0x10e   : > { %v1210_v47 = vcombine.low %v1202_v14, %v1209_v24  ;;  %v1243_v52 = vrot.slane %v4553_v63, %v3255_v19  ;;  %v4558_v27 = vcombine.low %v4556_v62, %v4557_v46  ;;  %v1219_v18 = vrot.slane %v1211_v60, %v3255_v19  ;;  %v4571_v14 = vld [vmem:[#allocation30_spill] sm:$0xff] }
 0x10f   : > { %3022 = vmatmul.mubr.msk.f32.gmra.mxu1 %vm996_vm8, %v995_v45  ;;  %v1236_v4 = vrot.slane %v1228_v40, %v3255_v19  ;;  %v1260_v41 = vrot.slane %v1246_v57, %v3255_v19  ;;  %v1280_v29 = vcombine.low %v4559_v58, %v3545_v61  ;;  %v1297_v25 = vcombine.low %v3585_v44, %v4517_v32  ;;  %v4565_v61 = vld [vmem:[#allocation16_spill] sm:$0xff]  ;;  %v4566_v44 = vld [vmem:[#allocation17_spill] sm:$0xff] }
 0x110   : > { %3032 = vmatprep.mubr.msk.f32.mxu1 %vm996_vm8, %v1176_v15  ;;  %v1227_v6 = vcombine.low %v1219_v18, %v1226_v48  ;;  %v1277_v26 = vrot.slane %v1263_v35, %v3255_v19  ;;  %v1279_v5 = vcombine.low %v4561_v17, %v4560_v36  ;;  %v4564_v55 = vcombine.low %v4562_v23, %v4563_v16 }
 0x111   : > { %v1244_v2 = vcombine.low %v1236_v4, %v1243_v52  ;;  %v1296_v21 = vcombine.low %v4513_v34, %v4516_v13  ;;  %v4567_v32 = vcombine.low %v4565_v61, %v4566_v44  ;;  %v1314_v43 = vcombine.low %v4568_v33, %v3603_v31  ;;  %v4570_v13 = vld [vmem:[#allocation25_spill] sm:$0xff] }
 0x112   : > { %v1253_v7 = vrot.slane %v4564_v55, %v3255_v19  ;;  %v1294_v15 = vrot.slane %v1280_v29, %v3255_v19  ;;  %v1331_v24 = vcombine.low %v4569_v11, %v4526_v42  ;;  %v1311_v60 = vrot.slane %v1297_v25, %v3255_v19 }
 0x113   : > { %3033 = vmatmul.mubr.msk.f32.vlgmr.msra.gmra.mxu1 %vm996_vm8, %v4558_v27  ;;  %v1270_v54 = vrot.slane %v4567_v32, %v3255_v19  ;;  %v1287_v34 = vrot.slane %v1279_v5, %v3255_v19  ;;  %v1313_v40 = vcombine.low %v4571_v14, %v4570_v13  ;;  %v1304_v31 = vrot.slane %v1296_v21, %v3255_v19  ;;  %v4154_v21 = vld [vmem:[%s4415_s3] ss:$0 sm:$0xff] }
 0x114   : > { %3035 = vmatprep.mubr.msk.f32.mxu1 %vm996_vm8, %v1210_v47  ;;  %v1261_v45 = vcombine.low %v1253_v7, %v1260_v41  ;;  %v1330_v0 = vcombine.low %v3617_v53, %v3613_v49  ;;  %v1348_v42 = vcombine.low %v3700_v20, %v3716_v50  ;;  %v1328_v48 = vrot.slane %v1314_v43, %v3255_v19 }
 0x115   : > { %v1278_v3 = vcombine.low %v1270_v54, %v1277_v26  ;;  %v1295_v10 = vcombine.low %v1287_v34, %v1294_v15  ;;  %v1345_v51 = vrot.slane %v1331_v24, %v3255_v19  ;;  %v1312_v57 = vcombine.low %v1304_v31, %v1311_v60 }
 0x116   : > { %v1365_v47 = vcombine.low %v3773_v30, %v3759_v1  ;;  %v1321_v63 = vrot.slane %v1313_v40, %v3255_v19  ;;  %v1347_v52 = vcombine.low %v3638_v56, %v3678_v59  ;;  %v1364_v49 = vcombine.low %v3712_v9, %v3756_v12 }
 0x117   : > { %3036 = vmatmul.mubr.msk.f32.gmra.mxu1 %vm996_vm8, %v1227_v6  ;;  %v1338_v53 = vrot.slane %v1330_v0, %v3255_v19  ;;  %v1382_v20 = vcombine.low %v3841_v39, %v3835_v37  ;;  %v1362_v1 = vrot.slane %v1348_v42, %v3255_v19  ;;  %v1381_v22 = vcombine.low %v3790_v38, %v3829_v28 }
 0x118   : > { %3038 = vmatprep.mubr.msk.f32.mxu1 %vm996_vm8, %v1244_v2  ;;  %v1329_v50 = vcombine.low %v1321_v63, %v1328_v48  ;;  %v1379_v8 = vrot.slane %v1365_v47, %v3255_v19  ;;  %v1355_v56 = vrot.slane %v1347_v52, %v3255_v19  ;;  %v1372_v59 = vrot.slane %v1364_v49, %v3255_v19 }
 0x119   : > { %v1346_v30 = vcombine.low %v1338_v53, %v1345_v51  ;;  %v1396_v12 = vrot.slane %v1382_v20, %v3255_v19  ;;  %v1389_v39 = vrot.slane %v1381_v22, %v3255_v19 }
 0x11a   : > { %v1363_v9 = vcombine.low %v1355_v56, %v1362_v1  ;;  %v1380_v37 = vcombine.low %v1372_v59, %v1379_v8 }
 0x11b   : > { %3039 = vmatmul.mubr.msk.f32.gmra.mxu1 %vm996_vm8, %v1261_v45  ;;  %v1397_v35 = vcombine.low %v1389_v39, %v1396_v12 }
 0x11c   : > { %3041 = vmatprep.mubr.msk.f32.mxu1 %vm996_vm8, %v1278_v3 }
 0x11f   : > { %3042 = vmatmul.mubr.msk.f32.gmra.mxu1 %vm996_vm8, %v1295_v10 }
 0x120   : > { %3044 = vmatprep.mubr.msk.f32.mxu1 %vm996_vm8, %v1312_v57 }
 0x123   : > { %3045 = vmatmul.mubr.msk.f32.gmra.mxu1 %vm996_vm8, %v1329_v50 }
 0x124   : > { %3047 = vmatprep.mubr.msk.f32.mxu1 %vm996_vm8, %v1346_v30 }
 0x127   : > { %3048 = vmatmul.mubr.msk.f32.gmra.mxu1 %vm996_vm8, %v1363_v9 }
 0x128   : > { %3050 = vmatprep.mubr.msk.f32.mxu1 %vm996_vm8, %v1380_v37 }
 0x12b   : > { %3051 = vmatmul.mubr.msk.f32.gmra.mxu1 %vm996_vm8, %v1397_v35 }
 0x17c   : > { %v3005_v38 = vpop.f32.mrf.mxu0 }
 0x17e   : > { %v1091_v28 = vpop.f32.mrf.mxu0 }
 0x186   : > { %v3008_v62 = vpop.f32.mrf.mxu0 }
 0x188   : > { %v1101_v46 = vpop.f32.mrf.mxu0 }
 0x191   : > { %v3011_v27 = vpop.f32.mrf.mxu0 }
 0x193   : > { %v1111_v18 = vpop.f32.mrf.mxu0 }
 0x1a0   : > { %v3014_v4 = vpop.f32.mrf.mxu0 }
 0x1a2   : > { %v4137_v6 = vpop.f32.mrf.mxu0 }
 0x1a5   : > { %v3063_v41 = vpop.f32.mrf.mxu0 }
 0x1a7   : > { %v1898_v29 = vpop.f32.mrf.mxu0 }
 0x1af   : > { %v3066_v26 = vpop.f32.mrf.mxu0 }
 0x1b1   : > { %v4139_v58 = vpop.f32.mrf.mxu1  ;;  %v1908_v17 = vpop.f32.mrf.mxu0 }
 0x1b3   : > { %v4141_v25 = vpop.f32.mrf.mxu1  ;;  %v3069_v16 = vpop.f32.mrf.mxu0 }
 0x1b5   : > { %v1918_v54 = vpop.f32.mrf.mxu0 }
 0x1ba   : > { %v3072_v34 = vpop.f32.mrf.mxu0 }
 0x1bc   : > { %v1928_v63 = vpop.f32.mrf.mxu0 }
 0x1c2   : > { %v4143_v2 = vpop.f32.mrf.mxu1 }
 0x1c4   : > { %v4145_v36 = vpop.f32.mrf.mxu1 }
 0x1cf   : > { %v4147_v5 = vpop.f32.mrf.mxu1 }
 0x1d1   : > { %v4149_v23 = vpop.f32.mrf.mxu1 }
 0x1d3   : > { %v3034_v55 = vpop.f32.mrf.mxu1 }
 0x1d4   : > { %v1498_v7 = vadd.f32 %v3034_v55, %v3005_v38  ;;  %v3075_v38 = vpop.f32.mrf.mxu0 }
 0x1d5   : > { %v1492_v61 = vpop.f32.mrf.mxu1 }
 0x1d6   : > { %v1968_v44 = vadd.f32 %v3063_v41, %v1498_v7  ;;  %v1493_v32 = vadd.f32 %v1492_v61, %v1091_v28  ;;  %v1938_v61 = vpop.f32.mrf.mxu0 }
 0x1d7   : > { %v3037_v33 = vpop.f32.mrf.mxu1 }
 0x1d8   : > { %v4157_v43 = vadd.f32 %v4154_v21, %v1968_v44  ;;  %v1967_v45 = vadd.f32 %v1898_v29, %v1493_v32  ;;  %v1508_v15 = vadd.f32 %v3037_v33, %v3008_v62 }
 0x1d9   : > { %v1502_v11 = vpop.f32.mrf.mxu1 }
 0x1da   : > { %v2017_v24 = vmul.f32 0.044715, %v4157_v43  ;;  %v4161_v3 = vadd.f32 %v4154_v21, %v1967_v45  ;;  %v1970_v60 = vadd.f32 %v3066_v26, %v1508_v15  ;;  %v1503_v13 = vadd.f32 %v1502_v11, %v1101_v46 }
 0x1db   : > { %v3040_v14 = vpop.f32.mrf.mxu1 }
 0x1dc   : > { %v2031_v40 = vmul.f32 %v2017_v24, %v4157_v43  ;;  %v2016_v31 = vmul.f32 0.044715, %v4161_v3  ;;  %v4166_v0 = vadd.f32 %v4154_v21, %v1970_v60  ;;  %v1969_v42 = vadd.f32 %v1908_v17, %v1503_v13 }
 0x1dd   : > { %v1518_v10 = vadd.f32 %v3040_v14, %v3011_v27  ;;  %v1512_v48 = vpop.f32.mrf.mxu1 }
 0x1de   : > { %v2045_v51 = vmul.f32 %v2031_v40, %v4157_v43  ;;  %v2030_v57 = vmul.f32 %v2016_v31, %v4161_v3  ;;  %v2019_v47 = vmul.f32 0.044715, %v4166_v0  ;;  %v4172_v52 = vadd.f32 %v4154_v21, %v1969_v42 }
 0x1df   : > { %v1972_v49 = vadd.f32 %v3069_v16, %v1518_v10  ;;  %v1513_v53 = vadd.f32 %v1512_v48, %v1111_v18  ;;  %v3043_v20 = vpop.f32.mrf.mxu1  ;;  %v3078_v10 = vpop.f32.mrf.mxu0 }
 0x1e0   : > { %v2059_v50 = vadd.f32 %v2045_v51, %v4157_v43  ;;  %v2044_v1 = vmul.f32 %v2030_v57, %v4161_v3  ;;  %v2033_v30 = vmul.f32 %v2019_v47, %v4166_v0  ;;  %v1528_v8 = vadd.f32 %v3043_v20, %v3014_v4 }
 0x1e1   : > { %v2018_v22 = vmul.f32 0.044715, %v4172_v52  ;;  %v4179_v56 = vadd.f32 %v4154_v21, %v1972_v49  ;;  %v1971_v59 = vadd.f32 %v1918_v54, %v1513_v53  ;;  %v1522_v9 = vpop.f32.mrf.mxu1 }
 0x1e2   : > { %v2073_v12 = vmul.f32 0.7978846, %v2059_v50  ;;  %v2058_v37 = vadd.f32 %v2044_v1, %v4161_v3  ;;  %v2047_v39 = vmul.f32 %v2033_v30, %v4166_v0  ;;  %v1974_v35 = vadd.f32 %v3072_v34, %v1528_v8 }
 0x1e3   : > { %v2032_v28 = vmul.f32 %v2018_v22, %v4172_v52  ;;  %v2021_v62 = vmul.f32 0.044715, %v4179_v56  ;;  %v4186_v46 = vadd.f32 %v4154_v21, %v1971_v59  ;;  %v3046_v27 = vpop.f32.mrf.mxu1  ;;  %v1523_v33 = vadd.f32 %v1522_v9, %v4137_v6 }
 0x1e4   : > { %3113 = vtanh.f32 %v2073_v12  ;;  %v2072_v18 = vmul.f32 0.7978846, %v2058_v37  ;;  %v2061_v4 = vadd.f32 %v2047_v39, %v4166_v0  ;;  %v4190_v41 = vadd.f32 %v4154_v21, %v1974_v35 }
 0x1e5   : > { %v2046_v29 = vmul.f32 %v2032_v28, %v4172_v52  ;;  %v2035_v26 = vmul.f32 %v2021_v62, %v4179_v56  ;;  %v2020_v17 = vmul.f32 0.044715, %v4186_v46  ;;  %v1532_v16 = vpop.f32.mrf.mxu1  ;;  %v1538_v11 = vadd.f32 %v3046_v27, %v4139_v58 }
 0x1e6   : > { %3115 = vtanh.f32 %v2072_v18  ;;  %v2075_v55 = vmul.f32 0.7978846, %v2061_v4  ;;  %v2023_v7 = vmul.f32 0.044715, %v4190_v41  ;;  %v1533_v24 = vadd.f32 %v1532_v16, %v4141_v25 }
 0x1e7   : > { %v2060_v44 = vadd.f32 %v2046_v29, %v4172_v52  ;;  %v2049_v32 = vmul.f32 %v2035_v26, %v4179_v56  ;;  %v2034_v54 = vmul.f32 %v2020_v17, %v4186_v46  ;;  %v3049_v45 = vpop.f32.mrf.mxu1  ;;  %v1973_v14 = vadd.f32 %v1928_v63, %v1523_v33 }
 0x1e8   : > { %3117 = vtanh.f32 %v2075_v55  ;;  %v2037_v15 = vmul.f32 %v2023_v7, %v4190_v41  ;;  %v1976_v31 = vadd.f32 %v3075_v38, %v1538_v11  ;;  %v1975_v42 = vadd.f32 %v1938_v61, %v1533_v24  ;;  %v1948_v11 = vpop.f32.mrf.mxu0 }
 0x1e9   : > { %v2074_v60 = vmul.f32 0.7978846, %v2060_v44  ;;  %v2063_v34 = vadd.f32 %v2049_v32, %v4179_v56  ;;  %v2048_v13 = vmul.f32 %v2034_v54, %v4186_v46  ;;  %v1548_v6 = vadd.f32 %v3049_v45, %v4143_v2  ;;  %v1542_v22 = vpop.f32.mrf.mxu1 }
 0x1ea   : > { %v2051_v40 = vmul.f32 %v2037_v15, %v4190_v41  ;;  %v1994_v58 = vadd.f32 %v4154_v21, %v1973_v14  ;;  %v1997_v57 = vadd.f32 %v4154_v21, %v1976_v31  ;;  %v4212_v47 = vadd.f32 %v4154_v21, %v1975_v42 }
 0x1eb   : > { %3119 = vtanh.f32 %v2074_v60  ;;  %v2077_v48 = vmul.f32 0.7978846, %v2063_v34  ;;  %v2062_v51 = vadd.f32 %v2048_v13, %v4186_v46  ;;  %v1978_v63 = vadd.f32 %v3078_v10, %v1548_v6  ;;  %v3052_v17 = vpop.f32.mrf.mxu1 }
 0x1ec   : > { %v2065_v25 = vadd.f32 %v2051_v40, %v4190_v41  ;;  %v2022_v53 = vmul.f32 0.044715, %v1994_v58  ;;  %v2025_v2 = vmul.f32 0.044715, %v1997_v57  ;;  %v2024_v1 = vmul.f32 0.044715, %v4212_v47 }
 0x1ed   : > { %3121 = vtanh.f32 %v2077_v48  ;;  %v2076_v49 = vmul.f32 0.7978846, %v2062_v51  ;;  %v4216_v30 = vadd.f32 %v4154_v21, %v1978_v63  ;;  %v2003_v37 = vmul.f32 0.5, %v4157_v43 }
 0x1ee   : > { %v2079_v20 = vmul.f32 0.7978846, %v2065_v25  ;;  %v2036_v50 = vmul.f32 %v2022_v53, %v1994_v58  ;;  %v2039_v8 = vmul.f32 %v2025_v2, %v1997_v57  ;;  %v2002_v28 = vmul.f32 0.5, %v4161_v3  ;;  %v3081_v25 = vpop.f32.mrf.mxu0  ;;  %v1552_v2 = vpop.f32.mrf.mxu1 }
 0x1ef   : > { %3123 = vtanh.f32 %v2076_v49  ;;  %v2027_v12 = vmul.f32 0.044715, %v4216_v30  ;;  %v2038_v27 = vmul.f32 %v2024_v1, %v4212_v47  ;;  %v2005_v55 = vmul.f32 0.5, %v4166_v0 }
 0x1f0   : > { %v2050_v9 = vmul.f32 %v2036_v50, %v1994_v58  ;;  %v2053_v35 = vmul.f32 %v2039_v8, %v1997_v57  ;;  %3125 = vtanh.f32 %v2079_v20  ;;  %v2004_v43 = vmul.f32 0.5, %v4172_v52 }
 0x1f1   : > { %v3114_v59 = vpop.eup %3113  ;;  %v2041_v26 = vmul.f32 %v2027_v12, %v4216_v30  ;;  %v2007_v32 = vmul.f32 0.5, %v4179_v56  ;;  %v1543_v33 = vadd.f32 %v1542_v22, %v4145_v36  ;;  %v1558_v45 = vadd.f32 %v3052_v17, %v4147_v5 }
 0x1f2   : > { %v2101_v39 = vadd.f32 1.0, %v3114_v59  ;;  %v2064_v62 = vadd.f32 %v2050_v9, %v1994_v58  ;;  %v2067_v29 = vadd.f32 %v2053_v35, %v1997_v57  ;;  %v2052_v52 = vmul.f32 %v2038_v27, %v4212_v47 }
 0x1f3   : > { %v3116_v38 = vpop.eup %3115  ;;  %v2055_v60 = vmul.f32 %v2041_v26, %v4216_v30  ;;  %v2006_v31 = vmul.f32 0.5, %v4186_v46  ;;  %v2009_v36 = vmul.f32 0.5, %v4190_v41  ;;  %v2008_v5 = vmul.f32 0.5, %v1994_v58 }
 0x1f4   : > { %v2115_v18 = vmul.f32 %v2101_v39, %v2003_v37  ;;  %v2100_v4 = vadd.f32 1.0, %v3116_v38  ;;  %v2078_v7 = vmul.f32 0.7978846, %v2064_v62  ;;  %v2081_v54 = vmul.f32 0.7978846, %v2067_v29 }
 0x1f5   : > { %v3118_v16 = vpop.eup %3117  ;;  %v4234_v6 = vmul.f32 0.5, %v1997_v57  ;;  %v4237_v10 = vmul.f32 0.5, %v4212_v47  ;;  %v1977_v48 = vadd.f32 %v1948_v11, %v1543_v33  ;;  %v2066_v20 = vadd.f32 %v2052_v52, %v4212_v47 }
 0x1f6   : > { %v2166_v61 = vrot.slane %v2115_v18, %v3255_v19  ;;  %v2114_v44 = vmul.f32 %v2100_v4, %v2002_v28  ;;  %v2103_v3 = vadd.f32 1.0, %v3118_v16  ;;  %3127 = vtanh.f32 %v2078_v7 }
 0x1f7   : > { %v2159_v34 = vcombine.high %v2115_v18, %v2115_v18  ;;  %3129 = vtanh.f32 %v2081_v54  ;;  %v2069_v58 = vadd.f32 %v2055_v60, %v4216_v30  ;;  %v1980_v57 = vadd.f32 %v3081_v25, %v1558_v45 }
 0x1f8   : > { %v3120_v15 = vpop.eup %3119  ;;  %v2142_v24 = vcombine.high %v2114_v44, %v2114_v44  ;;  %v2149_v0 = vrot.slane %v2114_v44, %v3255_v19  ;;  %v2117_v13 = vmul.f32 %v2103_v3, %v2005_v55  ;;  %v2174_v40 = vcombine.high %v2166_v61, %v2166_v61 }
 0x1f9   : > { %v2102_v14 = vadd.f32 1.0, %v3120_v15  ;;  %v4242_v46 = vrot.slane %v2159_v34, %v3255_v19  ;;  %v4248_v22 = vmul.f32 0.5, %v4216_v30  ;;  %v4253_v12 = vadd.f32 %v1552_v2, %v4149_v23 }
 0x1fa   : > { %v3122_v56 = vpop.eup %3121  ;;  %v2156_v63 = vrot.slane %v2142_v24, %v3255_v19  ;;  %v2157_v49 = vcombine.high %v2149_v0, %v2149_v0  ;;  %v2193_v41 = vcombine.high %v2117_v13, %v2117_v13  ;;  %v4245_v50 = vcombine.low %v2166_v61, %v2174_v40 }
 0x1fb   : > { %v2116_v42 = vmul.f32 %v2102_v14, %v2004_v43  ;;  %v2105_v53 = vadd.f32 1.0, %v3122_v56  ;;  %v2200_v59 = vrot.slane %v2117_v13, %v3255_v19  ;;  %v2080_v38 = vmul.f32 0.7978846, %v2066_v20 }
 0x1fc   : > { %v3124_v51 = vpop.eup %3123  ;;  %v2158_v39 = vcombine.high %v2156_v63, %v2156_v63  ;;  %v4255_v35 = vcombine.low %v2149_v0, %v2157_v49  ;;  %v1998_v28 = vadd.f32 %v4154_v21, %v1977_v48  ;;  %v2411_v62 = vrot.slane %v4242_v46, %v3255_v19 }
 0x1fd   : > { %v2176_v1 = vcombine.high %v2116_v42, %v2116_v42  ;;  %v2104_v8 = vadd.f32 1.0, %v3124_v51  ;;  %v2183_v9 = vrot.slane %v2116_v42, %v3255_v19  ;;  %v2119_v47 = vmul.f32 %v2105_v53, %v2007_v32  ;;  %v3126_v37 = vpop.eup %3125 }
 0x1fe   : > { %v2207_v30 = vrot.slane %v2193_v41, %v3255_v19  ;;  %v2083_v27 = vmul.f32 0.7978846, %v2069_v58  ;;  %v2001_v18 = vadd.f32 %v4154_v21, %v1980_v57  ;;  %v2404_v4 = vrot.slane %v4245_v50, %v3255_v19 }
 0x1ff   : > { %v2175_v23 = vcombine.high %v4242_v46, %v4242_v46  ;;  %v2190_v29 = vrot.slane %v2176_v1, %v3255_v19  ;;  %v2118_v26 = vmul.f32 %v2104_v8, %v2006_v31  ;;  %v2208_v17 = vcombine.high %v2200_v59, %v2200_v59 }
 0x200   : > { %v2191_v16 = vcombine.high %v2183_v9, %v2183_v9  ;;  %v2227_v55 = vcombine.high %v2119_v47, %v2119_v47  ;;  %v4268_v43 = vrot.slane %v2119_v47, %v3255_v19  ;;  %v4270_v61 = vcombine.low %v2156_v63, %v2158_v39 }
 0x201   : > { %v2388_v44 = vrot.slane %v4255_v35, %v3255_v19  ;;  %v2107_v3 = vadd.f32 1.0, %v3126_v37  ;;  %3131 = vtanh.f32 %v2080_v38  ;;  %v2209_v32 = vcombine.high %v2207_v30, %v2207_v30 }
 0x202   : > { %v4274_v54 = vcombine.low %v2175_v23, %v2183_v9  ;;  %3133 = vtanh.f32 %v2083_v27  ;;  %v2192_v15 = vcombine.high %v2190_v29, %v2190_v29  ;;  %v2210_v11 = vcombine.high %v2118_v26, %v2118_v26  ;;  %v1958_v9 = vpop.f32.mrf.mxu0 }
 0x203   : > { %v3128_v7 = vpop.eup %3127  ;;  %v2217_v24 = vrot.slane %v2118_v26, %v3255_v19  ;;  %v2026_v0 = vmul.f32 0.044715, %v1998_v28  ;;  %v4277_v52 = vcombine.low %v2191_v16, %v2190_v29  ;;  %v2241_v60 = vrot.slane %v2227_v55, %v3255_v19 }
 0x204   : > { %v2106_v33 = vadd.f32 1.0, %v3128_v7  ;;  %v3130_v45 = vpop.eup %3129  ;;  %v2242_v34 = vcombine.high %v4268_v43, %v4268_v43  ;;  %v2121_v13 = vmul.f32 %v2107_v3, %v2009_v36  ;;  %v2029_v31 = vmul.f32 0.044715, %v2001_v18 }
 0x205   : > { %v2109_v56 = vadd.f32 1.0, %v3130_v45  ;;  %v2040_v40 = vmul.f32 %v2026_v0, %v1998_v28  ;;  %v2395_v42 = vrot.slane %v4270_v61, %v3255_v19  ;;  %v4285_v48 = vrot.slane %v2208_v17, %v3255_v19 }
 0x206   : > { %v2120_v14 = vmul.f32 %v2106_v33, %v2008_v5  ;;  %v4287_v51 = vcombine.low %v2207_v30, %v2209_v32  ;;  %v2421_v25 = vrot.slane %v4274_v54, %v3255_v19  ;;  %v2477_v63 = vrot.slane %v4268_v43, %v3255_v19 }
 0x207   : > { %v2224_v36 = vrot.slane %v2210_v11, %v3255_v19  ;;  %v2225_v5 = vcombine.high %v2217_v24, %v2217_v24  ;;  %v2054_v49 = vmul.f32 %v2040_v40, %v1998_v28  ;;  %v2428_v53 = vrot.slane %v4277_v52, %v3255_v19 }
 0x208   : > { %v2430_v20 = vcombine.low %v2192_v15, %v2200_v59  ;;  %v2261_v2 = vcombine.high %v2121_v13, %v2121_v13  ;;  %v2043_v41 = vmul.f32 %v2029_v31, %v2001_v18  ;;  %v4296_v58 = vcombine.low %v2242_v34, %v2241_v60 }
 0x209   : > { %v2268_v57 = vrot.slane %v2121_v13, %v3255_v19  ;;  %v2244_v1 = vcombine.high %v2120_v14, %v2120_v14  ;;  %v2123_v8 = vmul.f32 %v2109_v56, %v4234_v6  ;;  %v2243_v47 = vcombine.high %v2241_v60, %v2241_v60 }
 0x20a   : > { %v2251_v37 = vrot.slane %v2120_v14, %v3255_v19  ;;  %v2068_v39 = vadd.f32 %v2054_v49, %v1998_v28  ;;  %v2057_v38 = vmul.f32 %v2043_v41, %v2001_v18  ;;  %v2226_v30 = vcombine.high %v2224_v36, %v2224_v36 }
 0x20b   : > { %v2447_v27 = vcombine.low %v2217_v24, %v2225_v5  ;;  %v4301_v23 = vmul.f32 0.5, %v1998_v28  ;;  %v1979_v59 = vadd.f32 %v1958_v9, %v4253_v12  ;;  %v2275_v29 = vrot.slane %v2261_v2, %v3255_v19 }
 0x20c   : > { %v2082_v26 = vmul.f32 0.7978846, %v2068_v39  ;;  %v4305_v17 = vmul.f32 0.5, %v2001_v18  ;;  %v2071_v16 = vadd.f32 %v2057_v38, %v2001_v18  ;;  %v2276_v55 = vcombine.high %v2268_v57, %v2268_v57 }
 0x20d   : > { %v2258_v6 = vrot.slane %v2244_v1, %v3255_v19  ;;  %v2295_v7 = vcombine.high %v2123_v8, %v2123_v8  ;;  %v2000_v61 = vadd.f32 %v4154_v21, %v1979_v59  ;;  %v2259_v32 = vcombine.high %v2251_v37, %v2251_v37 }
 0x20e   : > { %v3132_v3 = vpop.eup %3131  ;;  %v4310_v54 = vrot.slane %v2123_v8, %v3255_v19  ;;  %3135 = vtanh.f32 %v2082_v26  ;;  %v2085_v28 = vmul.f32 0.7978846, %v2071_v16  ;;  %v2461_v33 = vrot.slane %v2447_v27, %v3255_v19 }
 0x20f   : > { %v3134_v12 = vpop.eup %3133  ;;  %v2463_v45 = vcombine.low %v2224_v36, %v2226_v30  ;;  %v2108_v15 = vadd.f32 1.0, %v3132_v3  ;;  %v2028_v11 = vmul.f32 0.044715, %v2000_v61  ;;  %v2277_v18 = vcombine.high %v2275_v29, %v2275_v29 }
 0x210   : > { %v2480_v24 = vcombine.low %v2243_v47, %v2251_v37  ;;  %v2111_v0 = vadd.f32 1.0, %v3134_v12  ;;  %3137 = vtanh.f32 %v2085_v28  ;;  %v2512_v52 = vcombine.low %v2268_v57, %v2276_v55 }
 0x211   : > { %v4314_v21 = vrot.slane %v2295_v7, %v3255_v19  ;;  %v2122_v60 = vmul.f32 %v2108_v15, %v4237_v10  ;;  %v2042_v34 = vmul.f32 %v2028_v11, %v2000_v61  ;;  %v2260_v13 = vcombine.high %v2258_v6, %v2258_v6 }
 0x212   : > { %v2496_v14 = vcombine.low %v2259_v32, %v2258_v6  ;;  %v2310_v56 = vcombine.high %v4310_v54, %v4310_v54  ;;  %v2437_v40 = vrot.slane %v2430_v20, %v3255_v19  ;;  %v2125_v5 = vmul.f32 %v2111_v0, %v4248_v22 }
 0x213   : > { %v2278_v31 = vcombine.high %v2122_v60, %v2122_v60  ;;  %v2285_v36 = vrot.slane %v2122_v60, %v3255_v19  ;;  %v2056_v49 = vmul.f32 %v2042_v34, %v2000_v61  ;;  %v2396_v2 = vcombine.low %v2388_v44, %v2395_v42 }
 0x214   : > { %v2412_v10 = vcombine.low %v2404_v4, %v2411_v62  ;;  %v2429_v41 = vcombine.low %v2421_v25, %v2428_v53  ;;  %v2470_v20 = vrot.slane %v2463_v45, %v3255_v19  ;;  %v2311_v22 = vcombine.high %v4314_v21, %v4314_v21 }
 0x215   : > { %v4333_v57 = vrot.slane %v2278_v31, %v3255_v19  ;;  %v2070_v1 = vadd.f32 %v2056_v49, %v2000_v61  ;;  %v2513_v8 = vcombine.low %v2275_v29, %v2277_v18  ;;  %v2445_v35 = vcombine.low %v2437_v40, %v4285_v48 }
 0x216   : > { %v2454_v46 = vrot.slane %v4287_v51, %v3255_v19  ;;  %v2487_v50 = vrot.slane %v4296_v58, %v3255_v19  ;;  %v2494_v62 = vrot.slane %v2480_v24, %v3255_v19  ;;  %v2293_v4 = vcombine.high %v2285_v36, %v2285_v36 }
 0x217   : > { %v2329_v44 = vcombine.high %v2125_v5, %v2125_v5  ;;  %v4343_v42 = vmul.f32 0.5, %v2000_v61  ;;  %v2084_v25 = vmul.f32 0.7978846, %v2070_v1  ;;  %v2478_v9 = vcombine.low %v2470_v20, %v2477_v63 }
 0x218   : > { %v2462_v53 = vcombine.low %v2454_v46, %v2461_v33  ;;  %v2503_v48 = vrot.slane %v2496_v14, %v3255_v19  ;;  %v2510_v47 = vrot.slane %v2260_v13, %v3255_v19  ;;  %v2336_v51 = vrot.slane %v2125_v5, %v3255_v19 }
 0x219   : > { %3139 = vtanh.f32 %v2084_v25  ;;  %v2294_v58 = vcombine.high %v4333_v57, %v4333_v57  ;;  %v2527_v37 = vrot.slane %v2513_v8, %v3255_v19  ;;  %v2495_v39 = vcombine.low %v2487_v50, %v2494_v62 }
 0x21a   : > { %v2520_v38 = vrot.slane %v2512_v52, %v3255_v19  ;;  %v2660_v30 = vsel %vm996_vm8, %v2396_v2, -inf  ;;  %v2671_v43 = vsel %vm2661_vm9, %v2445_v35, -inf  ;;  %v2529_v27 = vcombine.low %v2285_v36, %v2293_v4 }
 0x21b   : > { %v3136_v63 = vpop.eup %3135  ;;  %v2343_v59 = vrot.slane %v2329_v44, %v3255_v19  ;;  %v2546_v29 = vcombine.low %v2310_v56, %v4314_v21  ;;  %v2670_v26 = vsel %vm996_vm8, %v2429_v41, -inf  ;;  %v2511_v55 = vcombine.low %v2503_v48, %v2510_v47 }
 0x21c   : > { %v2110_v16 = vadd.f32 1.0, %v3136_v63  ;;  %v2662_v6 = vsel %vm2661_vm9, %v2412_v10, -inf  ;;  %v2672_v7 = vmax.f32 %v2670_v26, %v2671_v43  ;;  %v2344_v3 = vcombine.high %v2336_v51, %v2336_v51 }
 0x21d   : > { %v3138_v61 = vpop.eup %3137  ;;  %v2528_v32 = vcombine.low %v2520_v38, %v2527_v37  ;;  %v2545_v28 = vcombine.low %v2294_v58, %v4310_v54  ;;  %v2663_v12 = vmax.f32 %v2660_v30, %v2662_v6  ;;  %v2543_v15 = vrot.slane %v4333_v57, %v3255_v19 }
 0x21e   : > { %v2124_v33 = vmul.f32 %v2110_v16, %v4301_v23  ;;  %v2113_v45 = vadd.f32 1.0, %v3138_v61  ;;  %v2680_v11 = vsel %vm2661_vm9, %v2478_v9, -inf  ;;  %v2345_v18 = vcombine.high %v2343_v59, %v2343_v59 }
 0x21f   : > { %v2536_v24 = vrot.slane %v2529_v27, %v3255_v19  ;;  %v2560_v0 = vrot.slane %v2546_v29, %v3255_v19  ;;  %v2679_v52 = vsel %vm996_vm8, %v2462_v53, -inf  ;;  %v2673_v34 = vrot.slane %v2672_v7, 4 }
 0x220   : > { %v2312_v21 = vcombine.high %v2124_v33, %v2124_v33  ;;  %v2319_v60 = vrot.slane %v2124_v33, %v3255_v19  ;;  %v2127_v54 = vmul.f32 %v2113_v45, %v4305_v17  ;;  %v2553_v23 = vrot.slane %v2545_v28, %v3255_v19 }
 0x221   : > { %v2664_v13 = vrot.slane %v2663_v12, 4  ;;  %v2681_v14 = vmax.f32 %v2679_v52, %v2680_v11  ;;  %v2689_v56 = vsel %vm2661_vm9, %v2511_v55, -inf  ;;  %v2579_v2 = vcombine.low %v2336_v51, %v2344_v3 }
 0x222   : > { %v2363_v40 = vcombine.high %v2127_v54, %v2127_v54  ;;  %v2326_v31 = vrot.slane %v2312_v21, %v3255_v19  ;;  %v2327_v36 = vcombine.high %v2319_v60, %v2319_v60  ;;  %v2370_v5 = vrot.slane %v2127_v54, %v3255_v19 }
 0x223   : > { %v2562_v49 = vcombine.low %v2311_v22, %v2319_v60  ;;  %v2595_v10 = vcombine.low %v2343_v59, %v2345_v18  ;;  %v2688_v41 = vsel %vm996_vm8, %v2495_v39, -inf  ;;  %v2674_v57 = vmax.f32 %v2672_v7, %v2673_v34 }
 0x224   : > { %v2328_v20 = vcombine.high %v2326_v31, %v2326_v31  ;;  %v2576_v17 = vrot.slane %v2327_v36, %v3255_v19  ;;  %v2690_v1 = vmax.f32 %v2688_v41, %v2689_v56  ;;  %v2544_v8 = vcombine.low %v2536_v24, %v2543_v15 }
 0x225   : > { %v2561_v35 = vcombine.low %v2553_v23, %v2560_v0  ;;  %v2569_v46 = vrot.slane %v2562_v49, %v3255_v19  ;;  %v2682_v50 = vrot.slane %v2681_v14, 4  ;;  %v2377_v4 = vrot.slane %v2363_v40, %v3255_v19 }
 0x226   : > { %v3140_v62 = vpop.eup %3139  ;;  %v2378_v44 = vcombine.high %v2370_v5, %v2370_v5  ;;  %v2578_v25 = vcombine.low %v2326_v31, %v2328_v20  ;;  %v2665_v22 = vmax.f32 %v2663_v12, %v2664_v13  ;;  %v2593_v48 = vrot.slane %v2579_v2, %v3255_v19 }
 0x227   : > { %v2112_v53 = vadd.f32 1.0, %v3140_v62  ;;  %v2577_v9 = vcombine.low %v2569_v46, %v2576_v17  ;;  %v2602_v47 = vrot.slane %v2595_v10, %v3255_v19  ;;  %v2675_v58 = vrot.slane %v2674_v57, 2 }
 0x228   : > { %v2586_v51 = vrot.slane %v2578_v25, %v3255_v19  ;;  %v2691_v37 = vrot.slane %v2690_v1, 4  ;;  %v2697_v39 = vsel %vm996_vm8, %v2528_v32, -inf  ;;  %v2683_v30 = vmax.f32 %v2681_v14, %v2682_v50 }
 0x229   : > { %v2126_v38 = vmul.f32 %v2112_v53, %v4343_v42  ;;  %v2698_v43 = vsel %vm2661_vm9, %v2544_v8, -inf  ;;  %v2706_v63 = vsel %vm996_vm8, %v2561_v35, -inf  ;;  %v2379_v27 = vcombine.high %v2377_v4, %v2377_v4 }
 0x22a   : > { %v2628_v59 = vcombine.low %v2378_v44, %v2377_v4  ;;  %v2666_v29 = vrot.slane %v2665_v22, 2  ;;  %v2699_v26 = vmax.f32 %v2697_v39, %v2698_v43  ;;  %v2594_v6 = vcombine.low %v2586_v51, %v2593_v48 }
 0x22b   : > { %v2346_v16 = vcombine.high %v2126_v38, %v2126_v38  ;;  %v2353_v55 = vrot.slane %v2126_v38, %v3255_v19  ;;  %v2707_v7 = vsel %vm2661_vm9, %v2577_v9, -inf  ;;  %v2676_v61 = vmax.f32 %v2674_v57, %v2675_v58 }
 0x22c   : > { %v2692_v3 = vmax.f32 %v2690_v1, %v2691_v37  ;;  %v2700_v32 = vrot.slane %v2699_v26, 4  ;;  %v2708_v28 = vmax.f32 %v2706_v63, %v2707_v7  ;;  %v2684_v45 = vrot.slane %v2683_v30, 2 }
 0x22d   : > { %v2360_v42 = vrot.slane %v2346_v16, %v3255_v19  ;;  %v2361_v12 = vcombine.high %v2353_v55, %v2353_v55  ;;  %v2609_v33 = vrot.slane %v2353_v55, %v3255_v19  ;;  %v2635_v15 = vrot.slane %v2628_v59, %v3255_v19 }
 0x22e   : > { %v2642_v11 = vrot.slane %v2379_v27, %v3255_v19  ;;  %v2701_v18 = vmax.f32 %v2699_v26, %v2700_v32  ;;  %v2709_v24 = vrot.slane %v2708_v28, 4  ;;  %v2715_v60 = vsel %vm996_vm8, %v2594_v6, -inf }
 0x22f   : > { %v2362_v0 = vcombine.high %v2360_v42, %v2360_v42  ;;  %v2610_v52 = vcombine.low %v2602_v47, %v2609_v33  ;;  %v2611_v21 = vcombine.low %v2361_v12, %v2360_v42  ;;  %v2693_v54 = vrot.slane %v2692_v3, 2 }
 0x230   : > { %v2710_v34 = vmax.f32 %v2708_v28, %v2709_v24  ;;  %v2685_v13 = vmax.f32 %v2683_v30, %v2684_v45  ;;  %v2702_v14 = vrot.slane %v2701_v18, 2  ;;  %v2667_v40 = vmax.f32 %v2665_v22, %v2666_v29 }
 0x231   : > { %v2612_v23 = vcombine.low %v2362_v0, %v2370_v5  ;;  %v2716_v56 = vsel %vm2661_vm9, %v2610_v52, -inf  ;;  %v2619_v36 = vrot.slane %v2611_v21, %v3255_v19  ;;  %v2643_v2 = vcombine.low %v2635_v15, %v2642_v11 }
 0x232   : > { %v2717_v31 = vmax.f32 %v2715_v60, %v2716_v56  ;;  %v2677_v10 = vrot.slane %v2676_v61, 1  ;;  %v2694_v41 = vmax.f32 %v2692_v3, %v2693_v54  ;;  %v2711_v20 = vrot.slane %v2710_v34, 2 }
 0x233   : > { %v2626_v49 = vrot.slane %v2612_v23, %v3255_v19  ;;  %v2686_v1 = vrot.slane %v2685_v13, 1  ;;  %v2703_v8 = vmax.f32 %v2701_v18, %v2702_v14  ;;  %v2668_v35 = vrot.slane %v2667_v40, 1 }
 0x234   : > { %v2718_v17 = vrot.slane %v2717_v31, 4  ;;  %v2678_v46 = vmax.f32 %v2676_v61, %v2677_v10  ;;  %v2725_v62 = vsel %vm2661_vm9, %v2643_v2, -inf  ;;  %v2695_v4 = vrot.slane %v2694_v41, 1 }
 0x235   : > { %v2627_v57 = vcombine.low %v2619_v36, %v2626_v49  ;;  %v2712_v44 = vmax.f32 %v2710_v34, %v2711_v20  ;;  %v2687_v19 = vmax.f32 %v2685_v13, %v2686_v1  ;;  %v2704_v53 = vrot.slane %v2703_v8, 1 }
 0x236   : > { %v2719_v5 = vmax.f32 %v2717_v31, %v2718_v17  ;;  %v2669_v9 = vmax.f32 %v2667_v40, %v2668_v35  ;;  %v2696_v51 = vmax.f32 %v2694_v41, %v2695_v4 }
 0x237   : > { %v2724_v50 = vsel %vm996_vm8, %v2627_v57, -inf  ;;  %v2713_v58 = vrot.slane %v2712_v44, 1  ;;  %v2705_v38 = vmax.f32 %v2703_v8, %v2704_v53 }
 0x238   : > { %v2720_v25 = vrot.slane %v2719_v5, 2  ;;  %v2726_v22 = vmax.f32 %v2724_v50, %v2725_v62  ;;  %v2742_v39 = vsel %vm2741_vm10, %v2678_v46, %v2669_v9 }
 0x239   : > { %v2743_v43 = vsel %vm571_vm2, %v2687_v19, %v2742_v39  ;;  %v2714_v27 = vmax.f32 %v2712_v44, %v2713_v58 }
 0x23a   : > { %v2721_v48 = vmax.f32 %v2719_v5, %v2720_v25  ;;  %v2727_v47 = vrot.slane %v2726_v22, 4  ;;  %v2745_v29 = vsel %vm2744_vm11, %v2696_v51, %v2743_v43 }
 0x23b   : > { %v2746_v16 = vsel %vm573_vm4, %v2705_v38, %v2745_v29 }
 0x23c   : > { %v2728_v37 = vmax.f32 %v2726_v22, %v2727_v47  ;;  %v2722_v30 = vrot.slane %v2721_v48, 1  ;;  %v2748_v7 = vsel %vm2747_vm12, %v2714_v27, %v2746_v16 }
 0x23e   : > { %v2729_v63 = vrot.slane %v2728_v37, 2  ;;  %v2723_v26 = vmax.f32 %v2721_v48, %v2722_v30 }
 0x240   : > { %v2730_v59 = vmax.f32 %v2728_v37, %v2729_v63  ;;  %v2749_v61 = vsel %vm575_vm6, %v2723_v26, %v2748_v7 }
 0x242   : > { %v2731_v55 = vrot.slane %v2730_v59, 1 }
 0x244   : > { %v2732_v6 = vmax.f32 %v2730_v59, %v2731_v55 }
 0x246   : > { %v2751_v3 = vsel %vm2750_vm13, %v2732_v6, %v2749_v61 }
 0x247   : > { %2753 = vxpose.xlu1.b32.start.end [1/1] (short) (narrow) %v2751_v3, 32 }
 0x2c3   : > { %v2769_v32 = vpop.trf.xlu1 }
 0x2c4   : > { %2785 = vst.msk [vmem:[%s3239_s9 + $0x20] sm:$0xff] %vm237_vm0, %v2769_v32 }
 0x2c7   : > { %v2770_v28 = vpop.trf.xlu1 }
 0x2c8   : > { %2786 = vst.msk [vmem:[%s3239_s9 + $0x28] sm:$0xff] %vm237_vm0, %v2770_v28 }
 0x2cb   : > { %v2771_v42 = vpop.trf.xlu1 }
 0x2cc   : > { %2787 = vst.msk [vmem:[%s3239_s9 + $0x30] sm:$0xff] %vm237_vm0, %v2771_v42 }
 0x2cf   : > { %v2772_v12 = vpop.trf.xlu1 }
 0x2d0   : > { %2788 = vst.msk [vmem:[%s3239_s9 + $0x38] sm:$0xff] %vm237_vm0, %v2772_v12 }
 0x2d1 PF: > { %s15_s15 = sadd.s32 1, %s3177_s15  }
 0x2d2   : > { %p12_p1 = scmp.ge.s32.totalorder %s15_s15, 4  }
 0x2d4   :  { %14 = sbr.rel (!%p12_p1) target bundleno = 1 (0x1), region = 76 }
 0x2d9   :  { %2810 = vsyncpa [#allocation3], 1 }
 0x2da   :  { %2812 = vsyncpa [#allocation3 + $0x1], 1 }

</bundles_post_ra>
